<compile_context>
chip_gen: v6e
topology: v6e:2x2x1
jax: 0.10.0
libtpu: 0.0.40
codegen_flags: <defaults>
</compile_context>

<pallas_src>
import functools

import jax
import jax.numpy as jnp
from jax import lax
from jax.experimental import pallas as pl
from jax.experimental.pallas import tpu as pltpu

INPUT_DIM = 128
HIDDEN_DIM = 64
NUM_CLASSES = 1

# TODO(synk): tokenizer + Albert-vocab embedder (self.embedder) are not
# translatable to a numeric kernel; features are taken as input instead.


def lstm_fc_kernel(x_ref, w_ih_ref, w_hh_ref, b_ref, w_fc_ref, b_fc_ref,
                   out_ref, xg_ref, hs_ref, h_ref, c_ref, *, t_total):
    """One (batch-tile, time-chunk) grid step of the LSTM + batched FC head.

    x_ref:    [Bp, Tc, D]      bf16 feature chunk, batch-first (HBM layout)
    w_ih_ref: [D, 4H]          bf16 input->gate weights, gate cols ordered i|f|o|g
    w_hh_ref: [H, 4H]          f32 hidden->gate weights, same column order
    b_ref:    [1, 4H]          f32 b_ih + b_hh, same column order
    w_fc_ref: [CP, H]          f32 fc weight, rows >= C are zero padding
    b_fc_ref: [CP, 1]          f32 fc bias (padded)
    out_ref:  [1, 1, CP, Tc*Bp] chunk output, lane-dense (one unmasked store)
    xg_ref:   [Tc, Bp, 4H]     VMEM scratch: hoisted input projection (t-major)
    hs_ref:   [Tc, Bp, H]      VMEM scratch: per-step hidden states
    h_ref:    [Bp, H]          VMEM scratch: h carried across time chunks
    c_ref:    [Bp, H]          VMEM scratch: c carried across time chunks
    """
    Bp, Tc, D = x_ref.shape
    H = w_hh_ref.shape[0]
    CP = w_fc_ref.shape[0]

    @pl.when(pl.program_id(1) == 0)
    def _init():
        h_ref[...] = jnp.zeros_like(h_ref)
        c_ref[...] = jnp.zeros_like(c_ref)

    x = x_ref[...]                                            # [Bp, Tc, D] bf16
    if t_total % Tc != 0:
        # Ragged last time chunk: zero padded timesteps in-kernel instead of
        # padding T in HBM (padded steps come after T, so this is cosmetic for
        # the valid region but keeps the tail deterministic).
        t_glob = (pl.program_id(1) * Tc
                  + lax.broadcasted_iota(jnp.int32, (Bp, Tc, D), 1))
        x = jnp.where(t_glob < t_total, x, jnp.zeros_like(x))

    # (1) Hoisted input projection: ONE bf16 MXU matmul (f32 accumulation) for
    #     the whole chunk, then a single f32 XLU rearrangement to t-major so the
    #     serial loop reads contiguous [Bp, 4H] slabs.
    xg_b = jnp.dot(x.reshape(Bp * Tc, D), w_ih_ref[...],
                   preferred_element_type=jnp.float32)        # [Bp*Tc, 4H] b-major
    xg_ref[...] = (pltpu.einshape("btg->tbg", xg_b.reshape(Bp, Tc, 4 * H))
                   + b_ref[...])

    w_hh = w_hh_ref[...]
    # TODO(synk): pin W_hh in the MXU weight registers across the recurrence
    # (pltpu.matmul_push_rhs / matmul_acc_lhs) and use MRB in-place accumulation
    # of xg on v7x; left as jnp.dot so Mosaic schedules the per-step matmul.

    # (2) Serial recurrence: only the tiny h @ W_hh + elementwise are on the
    #     critical path; (h, c) carried in vregs, bounded unroll.
    def step(t, carry):
        h, c = carry
        gates = xg_ref[t] + jnp.dot(h, w_hh,
                                    preferred_element_type=jnp.float32)  # [Bp, 4H]
        # Gate columns pre-ordered [i | f | o | g]: one wide sigmoid + one tanh.
        sig = jax.nn.sigmoid(gates[:, :3 * H])
        g_g = jnp.tanh(gates[:, 3 * H:])
        i_g = sig[:, :H]
        f_g = sig[:, H:2 * H]
        o_g = sig[:, 2 * H:]
        c_new = f_g * c + i_g * g_g
        h_new = o_g * jnp.tanh(c_new)
        hs_ref[t] = h_new
        return h_new, c_new

    h_fin, c_fin = lax.fori_loop(0, Tc, step, (h_ref[...], c_ref[...]),
                                 unroll=min(8, Tc))
    h_ref[...] = h_fin
    c_ref[...] = c_fin

    # (3) Lane-dense FC head: [CP, H] @ [H, Tc*Bp] -> [CP, Tc*Bp]; one dense
    #     (unmasked, contiguous) store for the whole chunk.
    hs_flat = hs_ref[...].reshape(Tc * Bp, H)
    fc = (jnp.dot(w_fc_ref[...], hs_flat.T, preferred_element_type=jnp.float32)
          + b_fc_ref[...])
    out_ref[...] = fc[None, None].astype(out_ref.dtype)


def _reorder_gates(w):
    """PyTorch LSTM gate order (i, f, g, o) along axis 0 -> (i, f, o, g)."""
    H = HIDDEN_DIM
    i, f, g, o = w[:H], w[H:2 * H], w[2 * H:3 * H], w[3 * H:]
    return jnp.concatenate([i, f, o, g], axis=0)


@functools.partial(jax.jit, static_argnames=("time_chunk",))
def naive_summarizer_forward(features, params, *, time_chunk=256):
    """features: [B, T, 128] (batch_first, like the PyTorch module).
    Returns:   [B, T, NUM_CLASSES] float32."""
    B, T, D = features.shape
    assert D == INPUT_DIM
    H, C = HIDDEN_DIM, NUM_CLASSES
    CP = ((C + 7) // 8) * 8          # pad FC output rows to a full sublane tile

    BP = 8                           # one f32 sublane tile of batch per grid row
    Bp_total = ((B + BP - 1) // BP) * BP
    n_btiles = Bp_total // BP

    Tc = min(T, time_chunk)          # Tc*BP is a multiple of 256 once T >= 32
    n_chunks = pl.cdiv(T, Tc)
    L = Tc * BP

    # Features stay batch-first in HBM (no wrapper-side time-major transpose or
    # time padding). One fused pass casts to bf16 (halves the dominant HBM
    # stream) and pads the batch to a multiple of 8; producers that already emit
    # bf16 with a batch multiple of 8 make this a no-op.
    x = features.astype(jnp.bfloat16)
    if Bp_total != B:
        x = jnp.pad(x, ((0, Bp_total - B), (0, 0), (0, 0)))

    # Weight prep (plain JAX glue): transpose + gate reorder + combined bias.
    w_ih = jnp.transpose(_reorder_gates(params["w_ih"])).astype(jnp.bfloat16)   # [D, 4H]
    w_hh = jnp.transpose(_reorder_gates(params["w_hh"])).astype(jnp.float32)    # [H, 4H]
    b = _reorder_gates(params["b_ih"] + params["b_hh"]).reshape(1, 4 * H)
    b = b.astype(jnp.float32)
    w_fc = jnp.zeros((CP, H), jnp.float32).at[:C].set(
        params["w_fc"].astype(jnp.float32))                                     # [CP, H]
    b_fc = jnp.zeros((CP, 1), jnp.float32).at[:C, 0].set(
        params["b_fc"].astype(jnp.float32))                                     # [CP, 1]

    cost = pl.CostEstimate(
        flops=2 * n_chunks * Tc * Bp_total * (D + H) * 4 * H
              + 2 * n_chunks * Tc * Bp_total * H * CP,
        # 3H sigmoids (exp + reciprocal) + 2H tanh per (t, b)
        transcendentals=8 * n_chunks * Tc * Bp_total * H,
        bytes_accessed=2 * Bp_total * T * D
                       + 4 * n_btiles * n_chunks * CP * L
                       + 2 * D * 4 * H + 4 * H * 4 * H + 4 * 4 * H
                       + 4 * CP * (H + 1),
    )

    kernel = functools.partial(lstm_fc_kernel, t_total=T)

    out_raw = pl.pallas_call(
        kernel,
        out_shape=jax.ShapeDtypeStruct((n_btiles, n_chunks, CP, L), jnp.float32),
        grid_spec=pltpu.PrefetchScalarGridSpec(
            num_scalar_prefetch=0,
            grid=(n_btiles, n_chunks),
            in_specs=[
                pl.BlockSpec((BP, Tc, D), lambda bi, ti: (bi, ti, 0)),   # x chunk
                pl.BlockSpec((D, 4 * H), lambda bi, ti: (0, 0)),         # w_ih
                pl.BlockSpec((H, 4 * H), lambda bi, ti: (0, 0)),         # w_hh
                pl.BlockSpec((1, 4 * H), lambda bi, ti: (0, 0)),         # bias
                pl.BlockSpec((CP, H), lambda bi, ti: (0, 0)),            # w_fc
                pl.BlockSpec((CP, 1), lambda bi, ti: (0, 0)),            # b_fc
            ],
            out_specs=pl.BlockSpec((1, 1, CP, L), lambda bi, ti: (bi, ti, 0, 0)),
            scratch_shapes=[
                pltpu.VMEM((Tc, BP, 4 * H), jnp.float32),   # xg (input proj, t-major)
                pltpu.VMEM((Tc, BP, H), jnp.float32),       # hidden states
                pltpu.VMEM((BP, H), jnp.float32),           # h carry
                pltpu.VMEM((BP, H), jnp.float32),           # c carry
            ],
        ),
        compiler_params=pltpu.CompilerParams(
            # batch tiles are independent (megacore/v7x 2-TC sharding);
            # time chunks carry (h, c) and must run in order.
            dimension_semantics=("parallel", "arbitrary"),
            vmem_limit_bytes=32 * 1024 * 1024,   # explicit; ~4 MiB actually used at Tc=256
        ),
        cost_estimate=cost,
    )(x, w_ih, w_hh, b, w_fc, b_fc)

    # Undo the lane-dense packing on the (tiny) output: [nb, nc, CP, Tc*BP]
    out = out_raw[:, :, :C, :]
    out = out.reshape(n_btiles, n_chunks, C, Tc, BP)
    out = jnp.transpose(out, (0, 4, 1, 3, 2))          # [nb, BP, nc, Tc, C]
    out = out.reshape(Bp_total, n_chunks * Tc, C)
    return out[:B, :T]                                  # [B, T, C]


def reference_forward(features, params, *, quantize_like_kernel=True):
    """Pure-JAX reference (same math as nn.LSTM + nn.Linear, PyTorch gate order).

    With quantize_like_kernel=True, x and W_ih are rounded to bf16 (the kernel
    keeps them bf16 in HBM / on the MXU), so the comparison is numerically tight.
    """
    H = HIDDEN_DIM
    x = features.astype(jnp.float32)
    w_ih = params["w_ih"].astype(jnp.float32)
    if quantize_like_kernel:
        x = x.astype(jnp.bfloat16).astype(jnp.float32)
        w_ih = w_ih.astype(jnp.bfloat16).astype(jnp.float32)

    x_tm = jnp.transpose(x, (1, 0, 2))
    w_ih_t = jnp.transpose(w_ih)
    w_hh_t = jnp.transpose(params["w_hh"]).astype(jnp.float32)
    b = (params["b_ih"] + params["b_hh"]).astype(jnp.float32)
    w_fc_t = jnp.transpose(params["w_fc"]).astype(jnp.float32)
    b_fc = params["b_fc"].astype(jnp.float32)

    def step(carry, x_t):
        h, c = carry
        gates = x_t @ w_ih_t + h @ w_hh_t + b
        i_g = jax.nn.sigmoid(gates[:, 0:H])
        f_g = jax.nn.sigmoid(gates[:, H:2 * H])
        g_g = jnp.tanh(gates[:, 2 * H:3 * H])
        o_g = jax.nn.sigmoid(gates[:, 3 * H:4 * H])
        c_new = f_g * c + i_g * g_g
        h_new = o_g * jnp.tanh(c_new)
        y = h_new @ w_fc_t + b_fc
        return (h_new, c_new), y

    B = features.shape[0]
    h0 = jnp.zeros((B, H), jnp.float32)
    c0 = jnp.zeros((B, H), jnp.float32)
    _, ys = lax.scan(step, (h0, c0), x_tm)
    return jnp.transpose(ys, (1, 0, 2))


def init_params(key):
    """Deterministic parameter init matching nn.LSTM(128,64,1) + nn.Linear(64,1)."""
    H, D, C = HIDDEN_DIM, INPUT_DIM, NUM_CLASSES
    k = jax.random.split(key, 6)
    scale = 1.0 / jnp.sqrt(H)
    return {
        "w_ih": scale * jax.random.normal(k[0], (4 * H, D), jnp.float32),
        "w_hh": scale * jax.random.normal(k[1], (4 * H, H), jnp.float32),
        "b_ih": scale * jax.random.normal(k[2], (4 * H,), jnp.float32),
        "b_hh": scale * jax.random.normal(k[3], (4 * H,), jnp.float32),
        "w_fc": scale * jax.random.normal(k[4], (C, H), jnp.float32),
        "b_fc": scale * jax.random.normal(k[5], (C,), jnp.float32),
    }


if __name__ == "__main__":
    key = jax.random.PRNGKey(0)
    k_feat, k_param = jax.random.split(key)

    # Small shapes consistent with the module: batch of padded "documents",
    # each a sequence of sentence embeddings of width 128.
    B, T = 2, 8
    features = jax.random.normal(k_feat, (B, T, INPUT_DIM), jnp.float32)
    params = init_params(k_param)

    out = jax.block_until_ready(naive_summarizer_forward(features, params))
    assert out.shape == (B, T, NUM_CLASSES)

    # Tight check against a reference that mirrors the kernel's bf16 input path.
    ref_q = jax.block_until_ready(
        reference_forward(features, params, quantize_like_kernel=True))
    assert jnp.allclose(out, ref_q, rtol=1e-3, atol=1e-3), \
        "mismatch vs bf16-matched JAX reference"

    # Looser check against the full-f32 reference (bounds the bf16 input error).
    ref_f32 = jax.block_until_ready(
        reference_forward(features, params, quantize_like_kernel=False))
    assert jnp.allclose(out, ref_f32, rtol=5e-2, atol=5e-2), \
        "mismatch vs f32 JAX reference"

    print("KERNEL_OK")
</pallas_src>

<mosaic_0001>
module attributes {stable_mosaic.version = 11 : i64} {
  func.func @lstm_fc_kernel(%arg0: i32, %arg1: i32, %arg2: memref<8x8x128xbf16, #tpu.memory_space<vmem>>, %arg3: memref<128x256xbf16, #tpu.memory_space<vmem>>, %arg4: memref<64x256xf32, #tpu.memory_space<vmem>>, %arg5: memref<1x256xf32, #tpu.memory_space<vmem>>, %arg6: memref<8x64xf32, #tpu.memory_space<vmem>>, %arg7: memref<8x1xf32, #tpu.memory_space<vmem>>, %arg8: memref<1x1x8x64xf32, #tpu.memory_space<vmem>>, %arg9: memref<8x8x256xf32, #tpu.memory_space<vmem>>, %arg10: memref<8x8x64xf32, #tpu.memory_space<vmem>>, %arg11: memref<8x64xf32, #tpu.memory_space<vmem>>, %arg12: memref<8x64xf32, #tpu.memory_space<vmem>>) attributes {dimension_semantics = [#tpu.dimension_semantics<parallel>, #tpu.dimension_semantics<arbitrary>], iteration_bounds = array<i64: 1, 1>, scalar_prefetch = 0 : i64, scratch_operands = 4 : i64, tpu.core_type = #tpu.core_type<tc>, window_params = [{transform_indices = @transform_0, window_bounds = array<i64: 8, 8, 128>}, {pipeline_mode = #tpu.pipeline_mode<synchronous>, transform_indices = @transform_1, window_bounds = array<i64: 128, 256>}, {pipeline_mode = #tpu.pipeline_mode<synchronous>, transform_indices = @transform_2, window_bounds = array<i64: 64, 256>}, {pipeline_mode = #tpu.pipeline_mode<synchronous>, transform_indices = @transform_3, window_bounds = array<i64: 1, 256>}, {pipeline_mode = #tpu.pipeline_mode<synchronous>, transform_indices = @transform_4, window_bounds = array<i64: 8, 64>}, {pipeline_mode = #tpu.pipeline_mode<synchronous>, transform_indices = @transform_5, window_bounds = array<i64: 8, 1>}, {transform_indices = @transform_6, window_bounds = array<i64: 1, 1, 8, 64>}]} {
    %c0_i32 = arith.constant 0 : i32
    %0 = arith.cmpi eq, %arg1, %c0_i32 : i32
    %1 = arith.extui %0 : i1 to i32
    %c0_i32_0 = arith.constant 0 : i32
    %2 = arith.cmpi ne, %1, %c0_i32_0 : i32
    scf.if %2 {
      %cst_81 = arith.constant 0.000000e+00 : f32
      %229 = vector.broadcast %cst_81 : f32 to vector<8x64xf32>
      %c0_82 = arith.constant 0 : index
      %c0_83 = arith.constant 0 : index
      %230 = vector.load %arg11[%c0_82, %c0_83] : memref<8x64xf32, #tpu.memory_space<vmem>>, vector<8x64xf32>
      tpu.vector_store %arg11[%c0_82, %c0_83], %229 {strides = array<i32>} : memref<8x64xf32, #tpu.memory_space<vmem>>, vector<8x64xf32>,
      %cst_84 = arith.constant 0.000000e+00 : f32
      %231 = vector.broadcast %cst_84 : f32 to vector<8x64xf32>
      %c0_85 = arith.constant 0 : index
      %c0_86 = arith.constant 0 : index
      %232 = vector.load %arg12[%c0_85, %c0_86] : memref<8x64xf32, #tpu.memory_space<vmem>>, vector<8x64xf32>
      tpu.vector_store %arg12[%c0_85, %c0_86], %231 {strides = array<i32>} : memref<8x64xf32, #tpu.memory_space<vmem>>, vector<8x64xf32>,
    } else {
    }
    %c0 = arith.constant 0 : index
    %c0_1 = arith.constant 0 : index
    %c0_2 = arith.constant 0 : index
    %3 = vector.load %arg2[%c0, %c0_1, %c0_2] : memref<8x8x128xbf16, #tpu.memory_space<vmem>>, vector<8x8x128xbf16>
    %4 = vector.shape_cast %3 : vector<8x8x128xbf16> to vector<64x128xbf16>
    %c0_3 = arith.constant 0 : index
    %c0_4 = arith.constant 0 : index
    %5 = vector.load %arg3[%c0_3, %c0_4] : memref<128x256xbf16, #tpu.memory_space<vmem>>, vector<128x256xbf16>
    %cst = arith.constant dense<0.000000e+00> : vector<64x256xf32>
    %6 = tpu.matmul %4, %5, %cst {dimension_numbers = #tpu.dot_dimension_numbers<[1], [0], [0], [1], [0, 0, 1, 1], [], []>} : vector<64x128xbf16>, vector<128x256xbf16>, vector<64x256xf32> -> vector<64x256xf32>
    %7 = vector.shape_cast %6 : vector<64x256xf32> to vector<8x8x256xf32>
    %8 = tpu.transpose %7, [1, 0, 2] : vector<8x8x256xf32> -> vector<8x8x256xf32>
    %c0_5 = arith.constant 0 : index
    %c0_6 = arith.constant 0 : index
    %9 = vector.load %arg5[%c0_5, %c0_6] : memref<1x256xf32, #tpu.memory_space<vmem>>, vector<1x256xf32>
    %10 = vector.shape_cast %9 : vector<1x256xf32> to vector<1x1x256xf32>
    %11 = vector.broadcast %10 : vector<1x1x256xf32> to vector<8x8x256xf32>
    %12 = arith.addf %8, %11 : vector<8x8x256xf32>
    %c0_7 = arith.constant 0 : index
    %c0_8 = arith.constant 0 : index
    %c0_9 = arith.constant 0 : index
    %13 = vector.load %arg9[%c0_7, %c0_8, %c0_9] : memref<8x8x256xf32, #tpu.memory_space<vmem>>, vector<8x8x256xf32>
    tpu.vector_store %arg9[%c0_7, %c0_8, %c0_9], %12 {strides = array<i32>} : memref<8x8x256xf32, #tpu.memory_space<vmem>>, vector<8x8x256xf32>,
    %c0_10 = arith.constant 0 : index
    %c0_11 = arith.constant 0 : index
    %14 = vector.load %arg4[%c0_10, %c0_11] : memref<64x256xf32, #tpu.memory_space<vmem>>, vector<64x256xf32>
    %c0_12 = arith.constant 0 : index
    %c0_13 = arith.constant 0 : index
    %15 = vector.load %arg11[%c0_12, %c0_13] : memref<8x64xf32, #tpu.memory_space<vmem>>, vector<8x64xf32>
    %c0_14 = arith.constant 0 : index
    %c0_15 = arith.constant 0 : index
    %16 = vector.load %arg12[%c0_14, %c0_15] : memref<8x64xf32, #tpu.memory_space<vmem>>, vector<8x64xf32>
    %c0_i32_16 = arith.constant 0 : i32
    %17 = arith.index_cast %c0_i32_16 : i32 to index
    %c0_17 = arith.constant 0 : index
    %c0_18 = arith.constant 0 : index
    %18 = vector.load %arg9[%17, %c0_17, %c0_18] : memref<8x8x256xf32, #tpu.memory_space<vmem>>, vector<1x8x256xf32>
    %19 = vector.shape_cast %18 : vector<1x8x256xf32> to vector<8x256xf32>
    %cst_19 = arith.constant dense<0.000000e+00> : vector<8x256xf32>
    %20 = tpu.matmul %15, %14, %cst_19 {dimension_numbers = #tpu.dot_dimension_numbers<[1], [0], [0], [1], [0, 0, 1, 1], [], []>} : vector<8x64xf32>, vector<64x256xf32>, vector<8x256xf32> -> vector<8x256xf32>
    %21 = arith.addf %19, %20 : vector<8x256xf32>
    %22 = vector.extract_strided_slice %21 {offsets = [0, 0], sizes = [8, 192], strides = [1, 1]} : vector<8x256xf32> to vector<8x192xf32>
    %23 = arith.negf %22 : vector<8x192xf32>
    %24 = math.exp %23 : vector<8x192xf32>
    %cst_20 = arith.constant 1.000000e+00 : f32
    %25 = vector.broadcast %cst_20 : f32 to vector<8x192xf32>
    %26 = arith.addf %25, %24 : vector<8x192xf32>
    %27 = arith.divf %25, %26 : vector<8x192xf32>
    %28 = vector.extract_strided_slice %21 {offsets = [0, 192], sizes = [8, 64], strides = [1, 1]} : vector<8x256xf32> to vector<8x64xf32>
    %29 = math.tanh %28 : vector<8x64xf32>
    %30 = vector.extract_strided_slice %27 {offsets = [0, 0], sizes = [8, 64], strides = [1, 1]} : vector<8x192xf32> to vector<8x64xf32>
    %31 = vector.extract_strided_slice %27 {offsets = [0, 64], sizes = [8, 64], strides = [1, 1]} : vector<8x192xf32> to vector<8x64xf32>
    %32 = vector.extract_strided_slice %27 {offsets = [0, 128], sizes = [8, 64], strides = [1, 1]} : vector<8x192xf32> to vector<8x64xf32>
    %33 = arith.mulf %31, %16 : vector<8x64xf32>
    %34 = arith.mulf %30, %29 : vector<8x64xf32>
    %35 = arith.addf %33, %34 : vector<8x64xf32>
    %36 = math.tanh %35 : vector<8x64xf32>
    %37 = arith.mulf %32, %36 : vector<8x64xf32>
    %38 = arith.index_cast %c0_i32_16 : i32 to index
    %c0_21 = arith.constant 0 : index
    %c0_22 = arith.constant 0 : index
    %39 = vector.load %arg10[%38, %c0_21, %c0_22] : memref<8x8x64xf32, #tpu.memory_space<vmem>>, vector<1x8x64xf32>
    %40 = vector.shape_cast %39 : vector<1x8x64xf32> to vector<8x64xf32>
    %41 = vector.shape_cast %37 : vector<8x64xf32> to vector<1x8x64xf32>
    tpu.vector_store %arg10[%38, %c0_21, %c0_22], %41 {strides = array<i32>} : memref<8x8x64xf32, #tpu.memory_space<vmem>>, vector<1x8x64xf32>,
    %c1_i32 = arith.constant 1 : i32
    %42 = arith.index_cast %c1_i32 : i32 to index
    %c0_23 = arith.constant 0 : index
    %c0_24 = arith.constant 0 : index
    %43 = vector.load %arg9[%42, %c0_23, %c0_24] : memref<8x8x256xf32, #tpu.memory_space<vmem>>, vector<1x8x256xf32>
    %44 = vector.shape_cast %43 : vector<1x8x256xf32> to vector<8x256xf32>
    %cst_25 = arith.constant dense<0.000000e+00> : vector<8x256xf32>
    %45 = tpu.matmul %37, %14, %cst_25 {dimension_numbers = #tpu.dot_dimension_numbers<[1], [0], [0], [1], [0, 0, 1, 1], [], []>} : vector<8x64xf32>, vector<64x256xf32>, vector<8x256xf32> -> vector<8x256xf32>
    %46 = arith.addf %44, %45 : vector<8x256xf32>
    %47 = vector.extract_strided_slice %46 {offsets = [0, 0], sizes = [8, 192], strides = [1, 1]} : vector<8x256xf32> to vector<8x192xf32>
    %48 = arith.negf %47 : vector<8x192xf32>
    %49 = math.exp %48 : vector<8x192xf32>
    %cst_26 = arith.constant 1.000000e+00 : f32
    %50 = vector.broadcast %cst_26 : f32 to vector<8x192xf32>
    %51 = arith.addf %50, %49 : vector<8x192xf32>
    %52 = arith.divf %50, %51 : vector<8x192xf32>
    %53 = vector.extract_strided_slice %46 {offsets = [0, 192], sizes = [8, 64], strides = [1, 1]} : vector<8x256xf32> to vector<8x64xf32>
    %54 = math.tanh %53 : vector<8x64xf32>
    %55 = vector.extract_strided_slice %52 {offsets = [0, 0], sizes = [8, 64], strides = [1, 1]} : vector<8x192xf32> to vector<8x64xf32>
    %56 = vector.extract_strided_slice %52 {offsets = [0, 64], sizes = [8, 64], strides = [1, 1]} : vector<8x192xf32> to vector<8x64xf32>
    %57 = vector.extract_strided_slice %52 {offsets = [0, 128], sizes = [8, 64], strides = [1, 1]} : vector<8x192xf32> to vector<8x64xf32>
    %58 = arith.mulf %56, %35 : vector<8x64xf32>
    %59 = arith.mulf %55, %54 : vector<8x64xf32>
    %60 = arith.addf %58, %59 : vector<8x64xf32>
    %61 = math.tanh %60 : vector<8x64xf32>
    %62 = arith.mulf %57, %61 : vector<8x64xf32>
    %63 = arith.index_cast %c1_i32 : i32 to index
    %c0_27 = arith.constant 0 : index
    %c0_28 = arith.constant 0 : index
    %64 = vector.load %arg10[%63, %c0_27, %c0_28] : memref<8x8x64xf32, #tpu.memory_space<vmem>>, vector<1x8x64xf32>
    %65 = vector.shape_cast %64 : vector<1x8x64xf32> to vector<8x64xf32>
    %66 = vector.shape_cast %62 : vector<8x64xf32> to vector<1x8x64xf32>
    tpu.vector_store %arg10[%63, %c0_27, %c0_28], %66 {strides = array<i32>} : memref<8x8x64xf32, #tpu.memory_space<vmem>>, vector<1x8x64xf32>,
    %c2_i32 = arith.constant 2 : i32
    %67 = arith.index_cast %c2_i32 : i32 to index
    %c0_29 = arith.constant 0 : index
    %c0_30 = arith.constant 0 : index
    %68 = vector.load %arg9[%67, %c0_29, %c0_30] : memref<8x8x256xf32, #tpu.memory_space<vmem>>, vector<1x8x256xf32>
    %69 = vector.shape_cast %68 : vector<1x8x256xf32> to vector<8x256xf32>
    %cst_31 = arith.constant dense<0.000000e+00> : vector<8x256xf32>
    %70 = tpu.matmul %62, %14, %cst_31 {dimension_numbers = #tpu.dot_dimension_numbers<[1], [0], [0], [1], [0, 0, 1, 1], [], []>} : vector<8x64xf32>, vector<64x256xf32>, vector<8x256xf32> -> vector<8x256xf32>
    %71 = arith.addf %69, %70 : vector<8x256xf32>
    %72 = vector.extract_strided_slice %71 {offsets = [0, 0], sizes = [8, 192], strides = [1, 1]} : vector<8x256xf32> to vector<8x192xf32>
    %73 = arith.negf %72 : vector<8x192xf32>
    %74 = math.exp %73 : vector<8x192xf32>
    %cst_32 = arith.constant 1.000000e+00 : f32
    %75 = vector.broadcast %cst_32 : f32 to vector<8x192xf32>
    %76 = arith.addf %75, %74 : vector<8x192xf32>
    %77 = arith.divf %75, %76 : vector<8x192xf32>
    %78 = vector.extract_strided_slice %71 {offsets = [0, 192], sizes = [8, 64], strides = [1, 1]} : vector<8x256xf32> to vector<8x64xf32>
    %79 = math.tanh %78 : vector<8x64xf32>
    %80 = vector.extract_strided_slice %77 {offsets = [0, 0], sizes = [8, 64], strides = [1, 1]} : vector<8x192xf32> to vector<8x64xf32>
    %81 = vector.extract_strided_slice %77 {offsets = [0, 64], sizes = [8, 64], strides = [1, 1]} : vector<8x192xf32> to vector<8x64xf32>
    %82 = vector.extract_strided_slice %77 {offsets = [0, 128], sizes = [8, 64], strides = [1, 1]} : vector<8x192xf32> to vector<8x64xf32>
    %83 = arith.mulf %81, %60 : vector<8x64xf32>
    %84 = arith.mulf %80, %79 : vector<8x64xf32>
    %85 = arith.addf %83, %84 : vector<8x64xf32>
    %86 = math.tanh %85 : vector<8x64xf32>
    %87 = arith.mulf %82, %86 : vector<8x64xf32>
    %88 = arith.index_cast %c2_i32 : i32 to index
    %c0_33 = arith.constant 0 : index
    %c0_34 = arith.constant 0 : index
    %89 = vector.load %arg10[%88, %c0_33, %c0_34] : memref<8x8x64xf32, #tpu.memory_space<vmem>>, vector<1x8x64xf32>
    %90 = vector.shape_cast %89 : vector<1x8x64xf32> to vector<8x64xf32>
    %91 = vector.shape_cast %87 : vector<8x64xf32> to vector<1x8x64xf32>
    tpu.vector_store %arg10[%88, %c0_33, %c0_34], %91 {strides = array<i32>} : memref<8x8x64xf32, #tpu.memory_space<vmem>>, vector<1x8x64xf32>,
    %c3_i32 = arith.constant 3 : i32
    %92 = arith.index_cast %c3_i32 : i32 to index
    %c0_35 = arith.constant 0 : index
    %c0_36 = arith.constant 0 : index
    %93 = vector.load %arg9[%92, %c0_35, %c0_36] : memref<8x8x256xf32, #tpu.memory_space<vmem>>, vector<1x8x256xf32>
    %94 = vector.shape_cast %93 : vector<1x8x256xf32> to vector<8x256xf32>
    %cst_37 = arith.constant dense<0.000000e+00> : vector<8x256xf32>
    %95 = tpu.matmul %87, %14, %cst_37 {dimension_numbers = #tpu.dot_dimension_numbers<[1], [0], [0], [1], [0, 0, 1, 1], [], []>} : vector<8x64xf32>, vector<64x256xf32>, vector<8x256xf32> -> vector<8x256xf32>
    %96 = arith.addf %94, %95 : vector<8x256xf32>
    %97 = vector.extract_strided_slice %96 {offsets = [0, 0], sizes = [8, 192], strides = [1, 1]} : vector<8x256xf32> to vector<8x192xf32>
    %98 = arith.negf %97 : vector<8x192xf32>
    %99 = math.exp %98 : vector<8x192xf32>
    %cst_38 = arith.constant 1.000000e+00 : f32
    %100 = vector.broadcast %cst_38 : f32 to vector<8x192xf32>
    %101 = arith.addf %100, %99 : vector<8x192xf32>
    %102 = arith.divf %100, %101 : vector<8x192xf32>
    %103 = vector.extract_strided_slice %96 {offsets = [0, 192], sizes = [8, 64], strides = [1, 1]} : vector<8x256xf32> to vector<8x64xf32>
    %104 = math.tanh %103 : vector<8x64xf32>
    %105 = vector.extract_strided_slice %102 {offsets = [0, 0], sizes = [8, 64], strides = [1, 1]} : vector<8x192xf32> to vector<8x64xf32>
    %106 = vector.extract_strided_slice %102 {offsets = [0, 64], sizes = [8, 64], strides = [1, 1]} : vector<8x192xf32> to vector<8x64xf32>
    %107 = vector.extract_strided_slice %102 {offsets = [0, 128], sizes = [8, 64], strides = [1, 1]} : vector<8x192xf32> to vector<8x64xf32>
    %108 = arith.mulf %106, %85 : vector<8x64xf32>
    %109 = arith.mulf %105, %104 : vector<8x64xf32>
    %110 = arith.addf %108, %109 : vector<8x64xf32>
    %111 = math.tanh %110 : vector<8x64xf32>
    %112 = arith.mulf %107, %111 : vector<8x64xf32>
    %113 = arith.index_cast %c3_i32 : i32 to index
    %c0_39 = arith.constant 0 : index
    %c0_40 = arith.constant 0 : index
    %114 = vector.load %arg10[%113, %c0_39, %c0_40] : memref<8x8x64xf32, #tpu.memory_space<vmem>>, vector<1x8x64xf32>
    %115 = vector.shape_cast %114 : vector<1x8x64xf32> to vector<8x64xf32>
    %116 = vector.shape_cast %112 : vector<8x64xf32> to vector<1x8x64xf32>
    tpu.vector_store %arg10[%113, %c0_39, %c0_40], %116 {strides = array<i32>} : memref<8x8x64xf32, #tpu.memory_space<vmem>>, vector<1x8x64xf32>,
    %c4_i32 = arith.constant 4 : i32
    %117 = arith.index_cast %c4_i32 : i32 to index
    %c0_41 = arith.constant 0 : index
    %c0_42 = arith.constant 0 : index
    %118 = vector.load %arg9[%117, %c0_41, %c0_42] : memref<8x8x256xf32, #tpu.memory_space<vmem>>, vector<1x8x256xf32>
    %119 = vector.shape_cast %118 : vector<1x8x256xf32> to vector<8x256xf32>
    %cst_43 = arith.constant dense<0.000000e+00> : vector<8x256xf32>
    %120 = tpu.matmul %112, %14, %cst_43 {dimension_numbers = #tpu.dot_dimension_numbers<[1], [0], [0], [1], [0, 0, 1, 1], [], []>} : vector<8x64xf32>, vector<64x256xf32>, vector<8x256xf32> -> vector<8x256xf32>
    %121 = arith.addf %119, %120 : vector<8x256xf32>
    %122 = vector.extract_strided_slice %121 {offsets = [0, 0], sizes = [8, 192], strides = [1, 1]} : vector<8x256xf32> to vector<8x192xf32>
    %123 = arith.negf %122 : vector<8x192xf32>
    %124 = math.exp %123 : vector<8x192xf32>
    %cst_44 = arith.constant 1.000000e+00 : f32
    %125 = vector.broadcast %cst_44 : f32 to vector<8x192xf32>
    %126 = arith.addf %125, %124 : vector<8x192xf32>
    %127 = arith.divf %125, %126 : vector<8x192xf32>
    %128 = vector.extract_strided_slice %121 {offsets = [0, 192], sizes = [8, 64], strides = [1, 1]} : vector<8x256xf32> to vector<8x64xf32>
    %129 = math.tanh %128 : vector<8x64xf32>
    %130 = vector.extract_strided_slice %127 {offsets = [0, 0], sizes = [8, 64], strides = [1, 1]} : vector<8x192xf32> to vector<8x64xf32>
    %131 = vector.extract_strided_slice %127 {offsets = [0, 64], sizes = [8, 64], strides = [1, 1]} : vector<8x192xf32> to vector<8x64xf32>
    %132 = vector.extract_strided_slice %127 {offsets = [0, 128], sizes = [8, 64], strides = [1, 1]} : vector<8x192xf32> to vector<8x64xf32>
    %133 = arith.mulf %131, %110 : vector<8x64xf32>
    %134 = arith.mulf %130, %129 : vector<8x64xf32>
    %135 = arith.addf %133, %134 : vector<8x64xf32>
    %136 = math.tanh %135 : vector<8x64xf32>
    %137 = arith.mulf %132, %136 : vector<8x64xf32>
    %138 = arith.index_cast %c4_i32 : i32 to index
    %c0_45 = arith.constant 0 : index
    %c0_46 = arith.constant 0 : index
    %139 = vector.load %arg10[%138, %c0_45, %c0_46] : memref<8x8x64xf32, #tpu.memory_space<vmem>>, vector<1x8x64xf32>
    %140 = vector.shape_cast %139 : vector<1x8x64xf32> to vector<8x64xf32>
    %141 = vector.shape_cast %137 : vector<8x64xf32> to vector<1x8x64xf32>
    tpu.vector_store %arg10[%138, %c0_45, %c0_46], %141 {strides = array<i32>} : memref<8x8x64xf32, #tpu.memory_space<vmem>>, vector<1x8x64xf32>,
    %c5_i32 = arith.constant 5 : i32
    %142 = arith.index_cast %c5_i32 : i32 to index
    %c0_47 = arith.constant 0 : index
    %c0_48 = arith.constant 0 : index
    %143 = vector.load %arg9[%142, %c0_47, %c0_48] : memref<8x8x256xf32, #tpu.memory_space<vmem>>, vector<1x8x256xf32>
    %144 = vector.shape_cast %143 : vector<1x8x256xf32> to vector<8x256xf32>
    %cst_49 = arith.constant dense<0.000000e+00> : vector<8x256xf32>
    %145 = tpu.matmul %137, %14, %cst_49 {dimension_numbers = #tpu.dot_dimension_numbers<[1], [0], [0], [1], [0, 0, 1, 1], [], []>} : vector<8x64xf32>, vector<64x256xf32>, vector<8x256xf32> -> vector<8x256xf32>
    %146 = arith.addf %144, %145 : vector<8x256xf32>
    %147 = vector.extract_strided_slice %146 {offsets = [0, 0], sizes = [8, 192], strides = [1, 1]} : vector<8x256xf32> to vector<8x192xf32>
    %148 = arith.negf %147 : vector<8x192xf32>
    %149 = math.exp %148 : vector<8x192xf32>
    %cst_50 = arith.constant 1.000000e+00 : f32
    %150 = vector.broadcast %cst_50 : f32 to vector<8x192xf32>
    %151 = arith.addf %150, %149 : vector<8x192xf32>
    %152 = arith.divf %150, %151 : vector<8x192xf32>
    %153 = vector.extract_strided_slice %146 {offsets = [0, 192], sizes = [8, 64], strides = [1, 1]} : vector<8x256xf32> to vector<8x64xf32>
    %154 = math.tanh %153 : vector<8x64xf32>
    %155 = vector.extract_strided_slice %152 {offsets = [0, 0], sizes = [8, 64], strides = [1, 1]} : vector<8x192xf32> to vector<8x64xf32>
    %156 = vector.extract_strided_slice %152 {offsets = [0, 64], sizes = [8, 64], strides = [1, 1]} : vector<8x192xf32> to vector<8x64xf32>
    %157 = vector.extract_strided_slice %152 {offsets = [0, 128], sizes = [8, 64], strides = [1, 1]} : vector<8x192xf32> to vector<8x64xf32>
    %158 = arith.mulf %156, %135 : vector<8x64xf32>
    %159 = arith.mulf %155, %154 : vector<8x64xf32>
    %160 = arith.addf %158, %159 : vector<8x64xf32>
    %161 = math.tanh %160 : vector<8x64xf32>
    %162 = arith.mulf %157, %161 : vector<8x64xf32>
    %163 = arith.index_cast %c5_i32 : i32 to index
    %c0_51 = arith.constant 0 : index
    %c0_52 = arith.constant 0 : index
    %164 = vector.load %arg10[%163, %c0_51, %c0_52] : memref<8x8x64xf32, #tpu.memory_space<vmem>>, vector<1x8x64xf32>
    %165 = vector.shape_cast %164 : vector<1x8x64xf32> to vector<8x64xf32>
    %166 = vector.shape_cast %162 : vector<8x64xf32> to vector<1x8x64xf32>
    tpu.vector_store %arg10[%163, %c0_51, %c0_52], %166 {strides = array<i32>} : memref<8x8x64xf32, #tpu.memory_space<vmem>>, vector<1x8x64xf32>,
    %c6_i32 = arith.constant 6 : i32
    %167 = arith.index_cast %c6_i32 : i32 to index
    %c0_53 = arith.constant 0 : index
    %c0_54 = arith.constant 0 : index
    %168 = vector.load %arg9[%167, %c0_53, %c0_54] : memref<8x8x256xf32, #tpu.memory_space<vmem>>, vector<1x8x256xf32>
    %169 = vector.shape_cast %168 : vector<1x8x256xf32> to vector<8x256xf32>
    %cst_55 = arith.constant dense<0.000000e+00> : vector<8x256xf32>
    %170 = tpu.matmul %162, %14, %cst_55 {dimension_numbers = #tpu.dot_dimension_numbers<[1], [0], [0], [1], [0, 0, 1, 1], [], []>} : vector<8x64xf32>, vector<64x256xf32>, vector<8x256xf32> -> vector<8x256xf32>
    %171 = arith.addf %169, %170 : vector<8x256xf32>
    %172 = vector.extract_strided_slice %171 {offsets = [0, 0], sizes = [8, 192], strides = [1, 1]} : vector<8x256xf32> to vector<8x192xf32>
    %173 = arith.negf %172 : vector<8x192xf32>
    %174 = math.exp %173 : vector<8x192xf32>
    %cst_56 = arith.constant 1.000000e+00 : f32
    %175 = vector.broadcast %cst_56 : f32 to vector<8x192xf32>
    %176 = arith.addf %175, %174 : vector<8x192xf32>
    %177 = arith.divf %175, %176 : vector<8x192xf32>
    %178 = vector.extract_strided_slice %171 {offsets = [0, 192], sizes = [8, 64], strides = [1, 1]} : vector<8x256xf32> to vector<8x64xf32>
    %179 = math.tanh %178 : vector<8x64xf32>
    %180 = vector.extract_strided_slice %177 {offsets = [0, 0], sizes = [8, 64], strides = [1, 1]} : vector<8x192xf32> to vector<8x64xf32>
    %181 = vector.extract_strided_slice %177 {offsets = [0, 64], sizes = [8, 64], strides = [1, 1]} : vector<8x192xf32> to vector<8x64xf32>
    %182 = vector.extract_strided_slice %177 {offsets = [0, 128], sizes = [8, 64], strides = [1, 1]} : vector<8x192xf32> to vector<8x64xf32>
    %183 = arith.mulf %181, %160 : vector<8x64xf32>
    %184 = arith.mulf %180, %179 : vector<8x64xf32>
    %185 = arith.addf %183, %184 : vector<8x64xf32>
    %186 = math.tanh %185 : vector<8x64xf32>
    %187 = arith.mulf %182, %186 : vector<8x64xf32>
    %188 = arith.index_cast %c6_i32 : i32 to index
    %c0_57 = arith.constant 0 : index
    %c0_58 = arith.constant 0 : index
    %189 = vector.load %arg10[%188, %c0_57, %c0_58] : memref<8x8x64xf32, #tpu.memory_space<vmem>>, vector<1x8x64xf32>
    %190 = vector.shape_cast %189 : vector<1x8x64xf32> to vector<8x64xf32>
    %191 = vector.shape_cast %187 : vector<8x64xf32> to vector<1x8x64xf32>
    tpu.vector_store %arg10[%188, %c0_57, %c0_58], %191 {strides = array<i32>} : memref<8x8x64xf32, #tpu.memory_space<vmem>>, vector<1x8x64xf32>,
    %c7_i32 = arith.constant 7 : i32
    %192 = arith.index_cast %c7_i32 : i32 to index
    %c0_59 = arith.constant 0 : index
    %c0_60 = arith.constant 0 : index
    %193 = vector.load %arg9[%192, %c0_59, %c0_60] : memref<8x8x256xf32, #tpu.memory_space<vmem>>, vector<1x8x256xf32>
    %194 = vector.shape_cast %193 : vector<1x8x256xf32> to vector<8x256xf32>
    %cst_61 = arith.constant dense<0.000000e+00> : vector<8x256xf32>
    %195 = tpu.matmul %187, %14, %cst_61 {dimension_numbers = #tpu.dot_dimension_numbers<[1], [0], [0], [1], [0, 0, 1, 1], [], []>} : vector<8x64xf32>, vector<64x256xf32>, vector<8x256xf32> -> vector<8x256xf32>
    %196 = arith.addf %194, %195 : vector<8x256xf32>
    %197 = vector.extract_strided_slice %196 {offsets = [0, 0], sizes = [8, 192], strides = [1, 1]} : vector<8x256xf32> to vector<8x192xf32>
    %198 = arith.negf %197 : vector<8x192xf32>
    %199 = math.exp %198 : vector<8x192xf32>
    %cst_62 = arith.constant 1.000000e+00 : f32
    %200 = vector.broadcast %cst_62 : f32 to vector<8x192xf32>
    %201 = arith.addf %200, %199 : vector<8x192xf32>
    %202 = arith.divf %200, %201 : vector<8x192xf32>
    %203 = vector.extract_strided_slice %196 {offsets = [0, 192], sizes = [8, 64], strides = [1, 1]} : vector<8x256xf32> to vector<8x64xf32>
    %204 = math.tanh %203 : vector<8x64xf32>
    %205 = vector.extract_strided_slice %202 {offsets = [0, 0], sizes = [8, 64], strides = [1, 1]} : vector<8x192xf32> to vector<8x64xf32>
    %206 = vector.extract_strided_slice %202 {offsets = [0, 64], sizes = [8, 64], strides = [1, 1]} : vector<8x192xf32> to vector<8x64xf32>
    %207 = vector.extract_strided_slice %202 {offsets = [0, 128], sizes = [8, 64], strides = [1, 1]} : vector<8x192xf32> to vector<8x64xf32>
    %208 = arith.mulf %206, %185 : vector<8x64xf32>
    %209 = arith.mulf %205, %204 : vector<8x64xf32>
    %210 = arith.addf %208, %209 : vector<8x64xf32>
    %211 = math.tanh %210 : vector<8x64xf32>
    %212 = arith.mulf %207, %211 : vector<8x64xf32>
    %213 = arith.index_cast %c7_i32 : i32 to index
    %c0_63 = arith.constant 0 : index
    %c0_64 = arith.constant 0 : index
    %214 = vector.load %arg10[%213, %c0_63, %c0_64] : memref<8x8x64xf32, #tpu.memory_space<vmem>>, vector<1x8x64xf32>
    %215 = vector.shape_cast %214 : vector<1x8x64xf32> to vector<8x64xf32>
    %216 = vector.shape_cast %212 : vector<8x64xf32> to vector<1x8x64xf32>
    tpu.vector_store %arg10[%213, %c0_63, %c0_64], %216 {strides = array<i32>} : memref<8x8x64xf32, #tpu.memory_space<vmem>>, vector<1x8x64xf32>,
    %c8_i32 = arith.constant 8 : i32
    %c0_65 = arith.constant 0 : index
    %c0_66 = arith.constant 0 : index
    %217 = vector.load %arg11[%c0_65, %c0_66] : memref<8x64xf32, #tpu.memory_space<vmem>>, vector<8x64xf32>
    tpu.vector_store %arg11[%c0_65, %c0_66], %212 {strides = array<i32>} : memref<8x64xf32, #tpu.memory_space<vmem>>, vector<8x64xf32>,
    %c0_67 = arith.constant 0 : index
    %c0_68 = arith.constant 0 : index
    %218 = vector.load %arg12[%c0_67, %c0_68] : memref<8x64xf32, #tpu.memory_space<vmem>>, vector<8x64xf32>
    tpu.vector_store %arg12[%c0_67, %c0_68], %210 {strides = array<i32>} : memref<8x64xf32, #tpu.memory_space<vmem>>, vector<8x64xf32>,
    %c0_69 = arith.constant 0 : index
    %c0_70 = arith.constant 0 : index
    %c0_71 = arith.constant 0 : index
    %219 = vector.load %arg10[%c0_69, %c0_70, %c0_71] : memref<8x8x64xf32, #tpu.memory_space<vmem>>, vector<8x8x64xf32>
    %220 = vector.shape_cast %219 : vector<8x8x64xf32> to vector<64x64xf32>
    %c0_72 = arith.constant 0 : index
    %c0_73 = arith.constant 0 : index
    %221 = vector.load %arg6[%c0_72, %c0_73] : memref<8x64xf32, #tpu.memory_space<vmem>>, vector<8x64xf32>
    %222 = tpu.transpose %220, [1, 0] : vector<64x64xf32> -> vector<64x64xf32>
    %cst_74 = arith.constant dense<0.000000e+00> : vector<8x64xf32>
    %223 = tpu.matmul %221, %222, %cst_74 {dimension_numbers = #tpu.dot_dimension_numbers<[1], [0], [0], [1], [0, 0, 1, 1], [], []>} : vector<8x64xf32>, vector<64x64xf32>, vector<8x64xf32> -> vector<8x64xf32>
    %c0_75 = arith.constant 0 : index
    %c0_76 = arith.constant 0 : index
    %224 = vector.load %arg7[%c0_75, %c0_76] : memref<8x1xf32, #tpu.memory_space<vmem>>, vector<8x1xf32>
    %225 = vector.broadcast %224 : vector<8x1xf32> to vector<8x64xf32>
    %226 = arith.addf %223, %225 : vector<8x64xf32>
    %227 = vector.shape_cast %226 : vector<8x64xf32> to vector<1x1x8x64xf32>
    %c0_77 = arith.constant 0 : index
    %c0_78 = arith.constant 0 : index
    %c0_79 = arith.constant 0 : index
    %c0_80 = arith.constant 0 : index
    %228 = vector.load %arg8[%c0_77, %c0_78, %c0_79, %c0_80] : memref<1x1x8x64xf32, #tpu.memory_space<vmem>>, vector<1x1x8x64xf32>
    tpu.vector_store %arg8[%c0_77, %c0_78, %c0_79, %c0_80], %227 {strides = array<i32>} : memref<1x1x8x64xf32, #tpu.memory_space<vmem>>, vector<1x1x8x64xf32>,
    return
  }
  func.func @transform_0(%arg0: i32, %arg1: i32) -> (i32, i32, i32) {
    %c0_i32 = arith.constant 0 : i32
    %c0_i32_0 = arith.constant 0 : i32
    return %arg0, %arg1, %c0_i32 : i32, i32, i32
  }
  func.func @transform_1(%arg0: i32, %arg1: i32) -> (i32, i32) {
    %c0_i32 = arith.constant 0 : i32
    %c0_i32_0 = arith.constant 0 : i32
    %c0_i32_1 = arith.constant 0 : i32
    return %c0_i32, %c0_i32_0 : i32, i32
  }
  func.func @transform_2(%arg0: i32, %arg1: i32) -> (i32, i32) {
    %c0_i32 = arith.constant 0 : i32
    %c0_i32_0 = arith.constant 0 : i32
    %c0_i32_1 = arith.constant 0 : i32
    return %c0_i32, %c0_i32_0 : i32, i32
  }
  func.func @transform_3(%arg0: i32, %arg1: i32) -> (i32, i32) {
    %c0_i32 = arith.constant 0 : i32
    %c0_i32_0 = arith.constant 0 : i32
    %c0_i32_1 = arith.constant 0 : i32
    return %c0_i32, %c0_i32_0 : i32, i32
  }
  func.func @transform_4(%arg0: i32, %arg1: i32) -> (i32, i32) {
    %c0_i32 = arith.constant 0 : i32
    %c0_i32_0 = arith.constant 0 : i32
    %c0_i32_1 = arith.constant 0 : i32
    return %c0_i32, %c0_i32_0 : i32, i32
  }
  func.func @transform_5(%arg0: i32, %arg1: i32) -> (i32, i32) {
    %c0_i32 = arith.constant 0 : i32
    %c0_i32_0 = arith.constant 0 : i32
    %c0_i32_1 = arith.constant 0 : i32
    return %c0_i32, %c0_i32_0 : i32, i32
  }
  func.func @transform_6(%arg0: i32, %arg1: i32) -> (i32, i32, i32, i32) {
    %c0_i32 = arith.constant 0 : i32
    %c0_i32_0 = arith.constant 0 : i32
    %c0_i32_1 = arith.constant 0 : i32
    return %arg0, %arg1, %c0_i32, %c0_i32_0 : i32, i32, i32, i32
  }
}

</mosaic_0001>

<bundles_post_ra>
// kernel: naive_summarizer_forward.1
= control target key start
LH: loop header
LB: loop body
LE: loop exit
PB: predicated region body
PF: predicated region fallthrough
CT: control target
= control target key end

     0   :  { %vm28_vm0 = vcmask 523264   ;;  %v1793_v1 = vmov 0   ;;  %v1794_v2 = vmov 0.0   ;;  %v237_v39 = vlaneseq  ;;  %s2313_s1 = inlined_call_operand.vmem [shape: bf16[128,256], index: 1, kind: input, shape index: {}]   ;;  %s2314_s0 = inlined_call_operand.vmem [shape: bf16[8,8,128], index: 0, kind: input, shape index: {}]   ;;  %s2315_s2 = inlined_call_operand.vmem [shape: f32[64,256], index: 2, kind: input, shape index: {}]   ;;  %s2316_s3 = inlined_call_operand.vmem [shape: f32[1,256], index: 3, kind: input, shape index: {}]   ;;  %s2317_s5 = inlined_call_operand.vmem [shape: f32[8,1], index: 5, kind: input, shape index: {}]   ;;  %s2318_s4 = inlined_call_operand.vmem [shape: f32[8,64], index: 4, kind: input, shape index: {}]   ;;  %s2319_s6 = inlined_call_operand.vmem [shape: f32[1,1,8,64], index: 6, kind: output, shape index: {}]  }
   0x1   :  { %v1669_v0 = vld [vmem:[%s2313_s1 + $0x74] ss:$8 sps:$4 sm:$0xff]   ;;  %191 = vmatprep.mubr.bf16.mxu0 %v1793_v1  ;;  %636 = vmatprep.mubr.f32.mxu1 %v1794_v2  ;;  %29 = vst.msk [vmem:[#allocation4] sm:$0xff] %vm28_vm0, %v1794_v2  ;;  %30 = vst.msk [vmem:[#allocation5] sm:$0xff] %vm28_vm0, %v1794_v2  ;;  %v1671_v3 = vld [vmem:[%s2313_s1 + $0x70] ss:$8 sps:$4 sm:$0xff]  }
   0x2   :  { %1667 = vset.pattern.permute.xlu1 %v1793_v1  ;;  %1668 = vset.pattern.permute.xlu0 %v1793_v1  ;;  %v1672_v4 = vld [vmem:[%s2313_s1 + $0x64] ss:$8 sps:$4 sm:$0xff]   ;;  %v1674_v5 = vld [vmem:[%s2313_s1 + $0x60] ss:$8 sps:$4 sm:$0xff]   ;;  %v1675_v6 = vld [vmem:[%s2313_s1 + $0x54] ss:$8 sps:$4 sm:$0xff]  }
   0x3   :  { %159 = vmatprep.subr.bf16.mxu0 %v1669_v0  ;;  %v1677_v7 = vld [vmem:[%s2313_s1 + $0x50] ss:$8 sps:$4 sm:$0xff]   ;;  %v1678_v8 = vld [vmem:[%s2313_s1 + $0x44] ss:$8 sps:$4 sm:$0xff]   ;;  %v1680_v9 = vld [vmem:[%s2313_s1 + $0x40] ss:$8 sps:$4 sm:$0xff]  }
   0x4   :  { %160 = vmatpush1.bf16.msra.mxu0 %v1671_v3  ;;  %v1681_v10 = vld [vmem:[%s2313_s1 + $0x34] ss:$8 sps:$4 sm:$0xff]   ;;  %v1683_v13 = vld [vmem:[%s2313_s1 + $0x30] ss:$8 sps:$4 sm:$0xff]   ;;  %v1887_v14 = vld [vmem:[%s2315_s2 + $0x68] sm:$0xff]  ;;  %v2038_v40 = vshrl.u32 %v237_v39, 7 }
   0x5   :  { %161 = vmatprep.subr.bf16.mxu0 %v1672_v4  ;;  %v1872_v11 = vld [vmem:[%s2315_s2 + $0x78] sm:$0xff]  ;;  %v1878_v12 = vld [vmem:[%s2315_s2 + $0x70] sm:$0xff]  ;;  %v1892_v15 = vld [vmem:[%s2315_s2 + $0x60] sm:$0xff]  ;;  %v1795_v44 = vmov 1983009808   ;;  %vm1798_vm1 = vmmov 0  }
   0x6   :  { %588 = vmatprep.subr.mxu1 %v1872_v11  ;;  %v1684_v16 = vld [vmem:[%s2313_s1 + $0x24] ss:$8 sps:$4 sm:$0xff]   ;;  %v1901_v17 = vld [vmem:[%s2315_s2 + $0x58] sm:$0xff]  ;;  %v1906_v18 = vld [vmem:[%s2315_s2 + $0x50] sm:$0xff]  ;;  %v508_v41 = vsub.s32 0, %v2038_v40  ;;  %v235_v45 = vunpack.c.l.s4 %v1795_v44 }
   0x7   :  { %589 = vmatpush1.msra.mxu1 %v1878_v12  ;;  %v1912_v19 = vld [vmem:[%s2315_s2 + $0x48] sm:$0xff]  ;;  %v1918_v20 = vld [vmem:[%s2315_s2 + $0x40] sm:$0xff]  ;;  %v1927_v22 = vld [vmem:[%s2315_s2 + $0x38] sm:$0xff]  ;;  %v1796_v51 = vmov 1934713408  }
   0x8   :  { %162 = vmatpush1.bf16.msra.mxu0 %v1674_v5  ;;  %590 = vmatprep.subr.mxu1 %v1887_v14  ;;  %v1686_v21 = vld [vmem:[%s2313_s1 + $0x20] ss:$8 sps:$4 sm:$0xff]   ;;  %v1687_v23 = vld [vmem:[%s2313_s1 + $0x14] ss:$8 sps:$4 sm:$0xff]   ;;  %v1689_v27 = vld [vmem:[%s2313_s1 + $0x10] ss:$8 sps:$4 sm:$0xff]   ;;  %v236_v48 = vunpack.c.0.s8 %v235_v45  ;;  %v299_v52 = vunpack.c.l.s4 %v1796_v51 }
   0x9   :  { %163 = vmatprep.subr.bf16.mxu0 %v1675_v6  ;;  %591 = vmatpush1.msra.mxu1 %v1892_v15  ;;  %v1936_v24 = vld [vmem:[%s2315_s2 + $0x30] sm:$0xff]  ;;  %v1942_v25 = vld [vmem:[%s2315_s2 + $0x28] sm:$0xff]  ;;  %v1948_v26 = vld [vmem:[%s2315_s2 + $0x20] sm:$0xff] }
   0xa   :  { %592 = vmatprep.subr.mxu1 %v1901_v17  ;;  %v1957_v28 = vld [vmem:[%s2315_s2 + $0x18] sm:$0xff]  ;;  %v1690_v29 = vld [vmem:[%s2313_s1 + $0x4] ss:$8 sps:$4 sm:$0xff]   ;;  %v1966_v30 = vld [vmem:[%s2315_s2 + $0x10] sm:$0xff]  ;;  %v2050_v53 = vsub.s32 %v236_v48, %v2038_v40  ;;  %v300_v58 = vunpack.c.0.s8 %v299_v52 }
   0xb   :  { %593 = vmatpush1.msra.mxu1 %v1906_v18  ;;  %v1972_v31 = vld [vmem:[%s2315_s2 + $0x8] sm:$0xff]  ;;  %v1978_v32 = vld [vmem:[%s2315_s2] sm:$0xff]  ;;  %v1695_v37 = vld [vmem:[%s2314_s0 + $0x10] sm:$0xff]  }
   0xc   :  { %164 = vmatpush1.bf16.msra.mxu0 %v1677_v7  ;;  %594 = vmatprep.subr.mxu1 %v1912_v19  ;;  %v1692_v33 = vld [vmem:[%s2313_s1] ss:$8 sps:$4 sm:$0xff]   ;;  %v1696_v38 = vld [vmem:[%s2314_s0 + $0x18] sm:$0xff]   ;;  %v2056_v5 = vsub.s32 %v300_v58, %v2038_v40 }
   0xd   :  { %165 = vmatprep.subr.bf16.mxu0 %v1678_v8  ;;  %595 = vmatpush1.msra.mxu1 %v1918_v20  ;;  %v564_v34 = vld [vmem:[#allocation4] sm:$0xff]  ;;  %v1694_v36 = vld [vmem:[%s2314_s0 + $0x8] sm:$0xff]  }
   0xe   :  { %596 = vmatprep.subr.mxu1 %v1927_v22  ;;  %v1693_v35 = vld [vmem:[%s2314_s0] sm:$0xff]   ;;  %s1797_s0 = smov 64  }
   0xf   :  { %597 = vmatpush1.msra.mxu1 %v1936_v24  ;;  %v2044_v42 = vld [vmem:[%s2316_s3] sm:$0x3] }
  0x10   :  { %166 = vmatpush1.bf16.msra.mxu0 %v1680_v9  ;;  %598 = vmatprep.subr.mxu1 %v1942_v25  ;;  %v2047_v43 = vrot.slane %v2044_v42, %v508_v41 }
  0x11   :  { %167 = vmatprep.subr.bf16.mxu0 %v1681_v10  ;;  %599 = vmatpush1.msra.mxu1 %v1948_v26 }
  0x12   :  { %600 = vmatprep.subr.mxu1 %v1957_v28 }
  0x13   :  { %601 = vmatpush1.msra.mxu1 %v1966_v30 }
  0x14   :  { %168 = vmatpush1.bf16.msra.mxu0 %v1683_v13  ;;  %602 = vmatprep.subr.mxu1 %v1972_v31 }
  0x15   :  { %169 = vmatprep.subr.bf16.mxu0 %v1684_v16  ;;  %603 = vmatpush1.msra.mxu1 %v1978_v32 }
  0x16   :  { %1600 = vmatmul.mubr.msk.f32.vlgmr.msra.gmra.mxu1 %vm28_vm0, %v564_v34  ;;  %702 = vmatprep.subr.mxu1 %v1872_v11 }
  0x17   :  { %703 = vmatpush1.msra.mxu1 %v1878_v12  ;;  %750 = vmatprep.mubr.f32.mxu1 %v1794_v2 }
  0x18   :  { %170 = vmatpush1.bf16.msra.mxu0 %v1686_v21  ;;  %704 = vmatprep.subr.mxu1 %v1887_v14 }
  0x19   :  { %171 = vmatprep.subr.bf16.mxu0 %v1687_v23  ;;  %705 = vmatpush1.msra.mxu1 %v1892_v15 }
  0x1a   :  { %706 = vmatprep.subr.mxu1 %v1901_v17 }
  0x1b   :  { %707 = vmatpush1.msra.mxu1 %v1906_v18 }
  0x1c   :  { %172 = vmatpush1.bf16.msra.mxu0 %v1689_v27  ;;  %708 = vmatprep.subr.mxu1 %v1912_v19 }
  0x1d   :  { %173 = vmatprep.subr.bf16.mxu0 %v1690_v29  ;;  %709 = vmatpush1.msra.mxu1 %v1918_v20 }
  0x1e   :  { %710 = vmatprep.subr.mxu1 %v1927_v22 }
  0x1f   :  { %711 = vmatpush1.msra.mxu1 %v1936_v24 }
  0x20   :  { %174 = vmatpush1.bf16.msra.mxu0 %v1692_v33  ;;  %712 = vmatprep.subr.mxu1 %v1942_v25 }
  0x21   :  { %924 = vmatprep.subr.mxu0 %v1872_v11  ;;  %713 = vmatpush1.msra.mxu1 %v1948_v26 }
  0x22   :  { %714 = vmatprep.subr.mxu1 %v1957_v28 }
  0x23   :  { %192 = vmatmul.mubr.bf16.vlgmr.msra.gmra.mxu0 %v1693_v35  ;;  %715 = vmatpush1.msra.mxu1 %v1966_v30 }
  0x24   :  { %201 = vmatprep.mubr.bf16.mxu0 %v1793_v1  ;;  %925 = vmatpush1.msra.mxu0 %v1878_v12 }
  0x25   :  { %926 = vmatprep.subr.mxu0 %v1887_v14  ;;  %716 = vmatprep.subr.mxu1 %v1972_v31 }
  0x26   :  { %927 = vmatpush1.msra.mxu0 %v1892_v15  ;;  %717 = vmatpush1.msra.mxu1 %v1978_v32 }
  0x27   :  { %928 = vmatprep.subr.mxu0 %v1901_v17  ;;  %813 = vmatprep.subr.mxu1 %v1872_v11 }
  0x28   :  { %929 = vmatpush1.msra.mxu0 %v1906_v18 }
  0x29   :  { %930 = vmatprep.subr.mxu0 %v1912_v19 }
  0x2a   :  { %931 = vmatpush1.msra.mxu0 %v1918_v20 }
  0x2b   :  { %202 = vmatmul.mubr.bf16.gmra.mxu0 %v1694_v36  ;;  %932 = vmatprep.subr.mxu0 %v1927_v22 }
  0x2c   :  { %211 = vmatprep.mubr.bf16.mxu0 %v1793_v1  ;;  %933 = vmatpush1.msra.mxu0 %v1936_v24 }
  0x2d   :  { %934 = vmatprep.subr.mxu0 %v1942_v25 }
  0x2e   :  { %935 = vmatpush1.msra.mxu0 %v1948_v26 }
  0x2f   :  { %936 = vmatprep.subr.mxu0 %v1957_v28 }
  0x30   :  { %937 = vmatpush1.msra.mxu0 %v1966_v30 }
  0x31   :  { %938 = vmatprep.subr.mxu0 %v1972_v31 }
  0x32   :  { %939 = vmatpush1.msra.mxu0 %v1978_v32 }
  0x33   :  { %212 = vmatmul.mubr.bf16.gmra.mxu0 %v1695_v37  ;;  %1146 = vmatprep.subr.mxu0 %v1872_v11 }
  0x34   :  { %221 = vmatprep.mubr.bf16.mxu0 %v1793_v1 }
  0x3b   :  { %222 = vmatmul.mubr.bf16.gmra.mxu0 %v1696_v38 }
  0x3c   :  { %972 = vmatprep.mubr.f32.mxu0 %v1794_v2 }
  0xe3   :  { %v193_v46 = vpop.f32.mrf.mxu0 }
  0xe5   :  { %v195_v47 = vpop.f32.mrf.mxu0 }
  0xe7   :  { %v197_v49 = vpop.f32.mrf.mxu0 }
  0xe9   :  { %v199_v50 = vpop.f32.mrf.mxu0 }
  0xeb   :  { %v203_v54 = vpop.f32.mrf.mxu0 }
  0xec   :  { %v232_v55 = vcombine.low %v193_v46, %v203_v54  ;;  %v233_v56 = vcombine.high %v193_v46, %v203_v54 }
  0xed   :  { %v205_v57 = vpop.f32.mrf.mxu0 }
  0xee   :  { %v240_v59 = vrot.slane %v232_v55, %v2050_v53  ;;  %v247_v60 = vrot.slane %v233_v56, %v2050_v53  ;;  %v369_v61 = vcombine.high %v195_v47, %v205_v57  ;;  %v368_v3 = vcombine.low %v195_v47, %v205_v57 }
  0xef   :  { %v207_v62 = vpop.f32.mrf.mxu0 }
  0xf0   :  { %v383_v63 = vrot.slane %v369_v61, %v2050_v53  ;;  %v248_v0 = vcombine.low %v197_v49, %v207_v62  ;;  %v249_v1 = vcombine.high %v197_v49, %v207_v62  ;;  %v376_v27 = vrot.slane %v368_v3, %v2050_v53 }
  0xf1   :  { %v209_v4 = vpop.f32.mrf.mxu0 }
  0xf2   :  { %v256_v6 = vrot.slane %v248_v0, %v2050_v53  ;;  %v263_v7 = vrot.slane %v249_v1, %v2050_v53  ;;  %v384_v8 = vcombine.low %v199_v50, %v209_v4  ;;  %v385_v9 = vcombine.high %v199_v50, %v209_v4 }
  0xf3   :  { %v213_v10 = vpop.f32.mrf.mxu0 }
  0xf4   :  { %v296_v13 = vcombine.low %v240_v59, %v256_v6  ;;  %v297_v16 = vcombine.high %v240_v59, %v256_v6  ;;  %v312_v21 = vcombine.low %v247_v60, %v263_v7  ;;  %v313_v23 = vcombine.high %v247_v60, %v263_v7 }
  0xf5   :  { %v392_v29 = vrot.slane %v384_v8, %v2050_v53  ;;  %v399_v33 = vrot.slane %v385_v9, %v2050_v53  ;;  %v215_v34 = vpop.f32.mrf.mxu0  ;;  %v512_v59 = vsub.s32 1, %v2038_v40 }
  0xf6   :  { %v304_v35 = vrot.slane %v296_v13, %v2056_v5  ;;  %v311_v36 = vrot.slane %v297_v16, %v2056_v5  ;;  %v2066_v37 = vrot.slane %v312_v21, %v2056_v5  ;;  %v2069_v38 = vrot.slane %v313_v23, %v2056_v5 }
  0xf7   :  { %v433_v39 = vcombine.high %v376_v27, %v392_v29  ;;  %v448_v41 = vcombine.low %v383_v63, %v399_v33  ;;  %v449_v44 = vcombine.high %v383_v63, %v399_v33  ;;  %v217_v45 = vpop.f32.mrf.mxu0  ;;  %v432_v63 = vcombine.low %v376_v27, %v392_v29 }
  0xf8   :  { %v513_v8 = vrot.slane %v2044_v42, %v512_v59 }
  0xf9   :  { %v219_v46 = vpop.f32.mrf.mxu0  ;;  %v2072_v47 = vrot.slane %v433_v39, %v2056_v5  ;;  %v2075_v48 = vrot.slane %v448_v41, %v2056_v5  ;;  %v2078_v49 = vrot.slane %v449_v44, %v2056_v5  ;;  %v440_v27 = vrot.slane %v432_v63, %v2056_v5 }
  0xfb   :  { %v223_v50 = vpop.f32.mrf.mxu0 }
  0xfc   :  { %v264_v51 = vcombine.low %v213_v10, %v223_v50  ;;  %v265_v52 = vcombine.high %v213_v10, %v223_v50 }
  0xfd   :  { %v225_v54 = vpop.f32.mrf.mxu0 }
  0xfe   :  { %v272_v55 = vrot.slane %v264_v51, %v2050_v53  ;;  %v279_v56 = vrot.slane %v265_v52, %v2050_v53  ;;  %v401_v57 = vcombine.high %v215_v34, %v225_v54  ;;  %v400_v0 = vcombine.low %v215_v34, %v225_v54 }
  0xff   :  { %v227_v58 = vpop.f32.mrf.mxu0 }
 0x100   :  { %v415_v60 = vrot.slane %v401_v57, %v2050_v53  ;;  %v280_v61 = vcombine.low %v217_v45, %v227_v58  ;;  %v281_v62 = vcombine.high %v217_v45, %v227_v58  ;;  %v408_v40 = vrot.slane %v400_v0, %v2050_v53  ;;  %v638_v58 = vpop.f32.mrf.mxu1 }
 0x101   :  { %v229_v1 = vpop.f32.mrf.mxu0 }
 0x102   :  { %v288_v3 = vrot.slane %v280_v61, %v2050_v53  ;;  %v295_v4 = vrot.slane %v281_v62, %v2050_v53  ;;  %v416_v6 = vcombine.low %v219_v46, %v229_v1  ;;  %v417_v7 = vcombine.high %v219_v46, %v229_v1 }
 0x104   :  { %v328_v9 = vcombine.low %v272_v55, %v288_v3  ;;  %v329_v10 = vcombine.high %v272_v55, %v288_v3  ;;  %v344_v13 = vcombine.low %v279_v56, %v295_v4  ;;  %v345_v16 = vcombine.high %v279_v56, %v295_v4 }
 0x105   :  { %v424_v21 = vrot.slane %v416_v6, %v2050_v53  ;;  %v431_v23 = vrot.slane %v417_v7, %v2050_v53 }
 0x106   :  { %v336_v29 = vrot.slane %v328_v9, %v2056_v5  ;;  %v343_v33 = vrot.slane %v329_v10, %v2056_v5  ;;  %v352_v34 = vrot.slane %v344_v13, %v2056_v5  ;;  %v359_v42 = vrot.slane %v345_v16, %v2056_v5  ;;  %v640_v13 = vpop.f32.mrf.mxu1 }
 0x107   :  { %v464_v39 = vcombine.low %v408_v40, %v424_v21  ;;  %v465_v41 = vcombine.high %v408_v40, %v424_v21  ;;  %v480_v44 = vcombine.low %v415_v60, %v431_v23  ;;  %v481_v45 = vcombine.high %v415_v60, %v431_v23 }
 0x108   :  { %v360_v46 = vcombine.low %v304_v35, %v336_v29  ;;  %v361_v50 = vcombine.high %v304_v35, %v336_v29  ;;  %v362_v51 = vcombine.low %v311_v36, %v343_v33  ;;  %v363_v52 = vcombine.high %v311_v36, %v343_v33 }
 0x109   :  { %v472_v53 = vrot.slane %v464_v39, %v2056_v5  ;;  %v479_v54 = vrot.slane %v465_v41, %v2056_v5  ;;  %v364_v55 = vcombine.low %v2066_v37, %v352_v34  ;;  %v488_v56 = vrot.slane %v480_v44, %v2056_v5 }
 0x10a   :  { %v516_v57 = vadd.f32 %v2047_v43, %v360_v46  ;;  %v2101_v59 = vadd.f32 %v2047_v43, %v361_v50  ;;  %v2104_v60 = vadd.f32 %v2047_v43, %v362_v51  ;;  %v2107_v35 = vadd.f32 %v2047_v43, %v363_v52 }
 0x10b   :  { %v496_v36 = vcombine.low %v440_v27, %v472_v53  ;;  %v497_v61 = vcombine.high %v440_v27, %v472_v53  ;;  %v498_v62 = vcombine.low %v2072_v47, %v479_v54  ;;  %v499_v63 = vcombine.high %v2072_v47, %v479_v54 }
 0x10c   :  { %v643_v0 = vadd.f32 %v638_v58, %v516_v57  ;;  %v2112_v1 = vadd.f32 %v2047_v43, %v364_v55  ;;  %v500_v3 = vcombine.low %v2075_v48, %v488_v56  ;;  %v365_v4 = vcombine.high %v2066_v37, %v352_v34 }
 0x10d   :  { %v517_v6 = vadd.f32 %v513_v8, %v496_v36  ;;  %v2116_v7 = vadd.f32 %v513_v8, %v497_v61  ;;  %v2118_v9 = vadd.f32 %v513_v8, %v498_v62  ;;  %v2120_v10 = vadd.f32 %v513_v8, %v499_v63 }
 0x10e   :  { %v2122_v16 = vadd.f32 %v513_v8, %v500_v3  ;;  %v2125_v47 = vadd.f32 %v2047_v43, %v365_v4  ;;  %v501_v40 = vcombine.high %v2075_v48, %v488_v56  ;;  %v366_v23 = vcombine.low %v2069_v38, %v359_v42 }
 0x10f   :  { %v644_v21 = vadd.f32 %v640_v13, %v517_v6  ;;  %v495_v37 = vrot.slane %v481_v45, %v2056_v5  ;;  %v367_v27 = vcombine.high %v2069_v38, %v359_v42  ;;  %v565_v38 = vld [vmem:[#allocation5] sm:$0xff]  ;;  %v1601_v42 = vmul.f32 -1.442695, %v643_v0 }
 0x110   :  { %v2131_v29 = vadd.f32 %v513_v8, %v501_v40  ;;  %v2134_v33 = vadd.f32 %v2047_v43, %v366_v23 }
 0x111   :  { %1697 = vtanh.f32 %v644_v21  ;;  %v502_v34 = vcombine.low %v2078_v49, %v495_v37  ;;  %v2138_v39 = vadd.f32 %v2047_v43, %v367_v27  ;;  %v503_v48 = vcombine.high %v2078_v49, %v495_v37 }
 0x112   :  { %1699 = vpow2.f32 %v1601_v42  ;;  %v1602_v55 = vmul.f32 -1.442695, %v644_v21 }
 0x113   :  { %v2141_v41 = vadd.f32 %v513_v8, %v502_v34  ;;  %v2143_v44 = vadd.f32 %v513_v8, %v503_v48 }
 0x11e   :  { %v1698_v5 = vpop.eup %1697 }
 0x11f   :  { %664 = vrot.lane.b32.xlu0 %v1698_v5, %s1797_s0  ;;  %v1700_v45 = vpop.eup %1699 }
 0x120   :  { %v651_v46 = vadd.f32 1.0, %v1700_v45 }
 0x122   :  { %1701 = vrcp.f32 %v651_v46 }
 0x123   :  { %659 = vrot.lane.b32.xlu0 %v565_v38, %s1797_s0 }
 0x12f   :  { %v1702_v43 = vpop.eup %1701 }
 0x191   :  { %v665_v50 = vpop.permute.xlu0 %664 }
 0x192   :  { %v667_v51 = vmul.f32 %v1702_v43, %v665_v50 }
 0x194   :  { %669 = vrot.lane.b32.xlu1 %v667_v51, %s1797_s0 }
 0x195   :  { %v660_v49 = vpop.permute.xlu0 %659 }
 0x196   :  { %v662_v8 = vmul.f32 %v1702_v43, %v660_v49 }
 0x206   :  { %v670_v52 = vpop.permute.xlu1 %669 }
 0x207   :  { %v672_v53 = vadd.f32 %v670_v52, %v662_v8 }
 0x209   :  { %1703 = vtanh.f32 %v672_v53 }
 0x20a   :  { %1705 = vpow2.f32 %v1602_v55 }
 0x216   :  { %v1704_v54 = vpop.eup %1703 }
 0x217   :  { %675 = vrot.lane.b32.xlu1 %v1704_v54, %s1797_s0  ;;  %v1706_v56 = vpop.eup %1705 }
 0x218   :  { %v652_v57 = vadd.f32 1.0, %v1706_v56 }
 0x21a   :  { %1707 = vrcp.f32 %v652_v57 }
 0x227   :  { %v1708_v58 = vpop.eup %1707 }
 0x289   :  { %v676_v36 = vpop.permute.xlu1 %675 }
 0x28a   :  { %v678_v61 = vmul.f32 %v1708_v58, %v676_v36 }
 0x28c   :  { %679 = vst.msk [vmem:[#allocation3] sm:$0xff] %vm28_vm0, %v678_v61  ;;  %1603 = vmatmul.mubr.msk.f32.vlgmr.msra.gmra.mxu1 %vm28_vm0, %v678_v61 }
 0x28d   :  { %814 = vmatpush1.msra.mxu1 %v1878_v12  ;;  %861 = vmatprep.mubr.f32.mxu1 %v1794_v2 }
 0x28e   :  { %815 = vmatprep.subr.mxu1 %v1887_v14 }
 0x28f   :  { %816 = vmatpush1.msra.mxu1 %v1892_v15 }
 0x290   :  { %817 = vmatprep.subr.mxu1 %v1901_v17 }
 0x291   :  { %818 = vmatpush1.msra.mxu1 %v1906_v18 }
 0x292   :  { %819 = vmatprep.subr.mxu1 %v1912_v19 }
 0x293   :  { %820 = vmatpush1.msra.mxu1 %v1918_v20 }
 0x294   :  { %821 = vmatprep.subr.mxu1 %v1927_v22 }
 0x295   :  { %822 = vmatpush1.msra.mxu1 %v1936_v24 }
 0x296   :  { %823 = vmatprep.subr.mxu1 %v1942_v25 }
 0x297   :  { %824 = vmatpush1.msra.mxu1 %v1948_v26 }
 0x298   :  { %825 = vmatprep.subr.mxu1 %v1957_v28 }
 0x299   :  { %826 = vmatpush1.msra.mxu1 %v1966_v30 }
 0x29a   :  { %827 = vmatprep.subr.mxu1 %v1972_v31 }
 0x29b   :  { %828 = vmatpush1.msra.mxu1 %v1978_v32 }
 0x29c   :  { %1035 = vmatprep.subr.mxu1 %v1872_v11 }
 0x34c   :  { %v752_v62 = vpop.f32.mrf.mxu1 }
 0x34d   :  { %v757_v63 = vadd.f32 %v752_v62, %v2101_v59 }
 0x34e   :  { %v754_v0 = vpop.f32.mrf.mxu1 }
 0x34f   :  { %v758_v3 = vadd.f32 %v754_v0, %v2116_v7  ;;  %v1604_v6 = vmul.f32 -1.442695, %v757_v63 }
 0x351   :  { %1709 = vtanh.f32 %v758_v3  ;;  %v1605_v7 = vmul.f32 -1.442695, %v758_v3 }
 0x352   :  { %1711 = vpow2.f32 %v1604_v6 }
 0x35e   :  { %v1710_v4 = vpop.eup %1709 }
 0x35f   :  { %774 = vrot.lane.b32.xlu0 %v1710_v4, %s1797_s0  ;;  %v1712_v13 = vpop.eup %1711 }
 0x360   :  { %v765_v40 = vadd.f32 1.0, %v1712_v13 }
 0x362   :  { %1713 = vrcp.f32 %v765_v40 }
 0x36f   :  { %v1714_v21 = vpop.eup %1713 }
 0x370   :  { %v772_v27 = vmul.f32 %v1714_v21, %v672_v53 }
 0x3d1   :  { %v775_v23 = vpop.permute.xlu0 %774 }
 0x3d2   :  { %v777_v37 = vmul.f32 %v1714_v21, %v775_v23 }
 0x3d4   :  { %779 = vrot.lane.b32.xlu1 %v777_v37, %s1797_s0 }
 0x446   :  { %v780_v34 = vpop.permute.xlu1 %779 }
 0x447   :  { %v782_v59 = vadd.f32 %v780_v34, %v772_v27 }
 0x449   :  { %1715 = vtanh.f32 %v782_v59 }
 0x44a   :  { %1717 = vpow2.f32 %v1605_v7 }
 0x456   :  { %v1716_v48 = vpop.eup %1715 }
 0x457   :  { %785 = vrot.lane.b32.xlu0 %v1716_v48, %s1797_s0  ;;  %v1718_v5 = vpop.eup %1717 }
 0x458   :  { %v766_v38 = vadd.f32 1.0, %v1718_v5 }
 0x45a   :  { %1719 = vrcp.f32 %v766_v38 }
 0x467   :  { %v1720_v42 = vpop.eup %1719 }
 0x4c9   :  { %v786_v45 = vpop.permute.xlu0 %785 }
 0x4ca   :  { %v788_v46 = vmul.f32 %v1720_v42, %v786_v45 }
 0x4cc   :  { %790 = vst.msk [vmem:[#allocation3 + $0x8] sm:$0xff] %vm28_vm0, %v788_v46  ;;  %1606 = vmatmul.mubr.msk.f32.vlgmr.msra.gmra.mxu1 %vm28_vm0, %v788_v46 }
 0x4cd   :  { %1036 = vmatpush1.msra.mxu1 %v1878_v12  ;;  %1083 = vmatprep.mubr.f32.mxu1 %v1794_v2 }
 0x4ce   :  { %1037 = vmatprep.subr.mxu1 %v1887_v14 }
 0x4cf   :  { %1038 = vmatpush1.msra.mxu1 %v1892_v15 }
 0x4d0   :  { %1039 = vmatprep.subr.mxu1 %v1901_v17 }
 0x4d1   :  { %1040 = vmatpush1.msra.mxu1 %v1906_v18 }
 0x4d2   :  { %1041 = vmatprep.subr.mxu1 %v1912_v19 }
 0x4d3   :  { %1042 = vmatpush1.msra.mxu1 %v1918_v20 }
 0x4d4   :  { %1043 = vmatprep.subr.mxu1 %v1927_v22 }
 0x4d5   :  { %1044 = vmatpush1.msra.mxu1 %v1936_v24 }
 0x4d6   :  { %1045 = vmatprep.subr.mxu1 %v1942_v25 }
 0x4d7   :  { %1046 = vmatpush1.msra.mxu1 %v1948_v26 }
 0x4d8   :  { %1047 = vmatprep.subr.mxu1 %v1957_v28 }
 0x4d9   :  { %1048 = vmatpush1.msra.mxu1 %v1966_v30 }
 0x4da   :  { %1049 = vmatprep.subr.mxu1 %v1972_v31 }
 0x4db   :  { %1050 = vmatpush1.msra.mxu1 %v1978_v32 }
 0x4dc   :  { %1257 = vmatprep.subr.mxu1 %v1872_v11 }
 0x58c   :  { %v863_v43 = vpop.f32.mrf.mxu1 }
 0x58d   :  { %v868_v50 = vadd.f32 %v863_v43, %v2104_v60 }
 0x58e   :  { %v865_v51 = vpop.f32.mrf.mxu1 }
 0x58f   :  { %v869_v49 = vadd.f32 %v865_v51, %v2118_v9  ;;  %v1607_v52 = vmul.f32 -1.442695, %v868_v50 }
 0x591   :  { %1721 = vtanh.f32 %v869_v49  ;;  %v1608_v9 = vmul.f32 -1.442695, %v869_v49 }
 0x592   :  { %1723 = vpow2.f32 %v1607_v52 }
 0x59e   :  { %v1722_v8 = vpop.eup %1721 }
 0x59f   :  { %885 = vrot.lane.b32.xlu1 %v1722_v8, %s1797_s0  ;;  %v1724_v53 = vpop.eup %1723 }
 0x5a0   :  { %v876_v54 = vadd.f32 1.0, %v1724_v53 }
 0x5a2   :  { %1725 = vrcp.f32 %v876_v54 }
 0x5af   :  { %v1726_v55 = vpop.eup %1725 }
 0x5b0   :  { %v883_v58 = vmul.f32 %v1726_v55, %v782_v59 }
 0x611   :  { %v886_v56 = vpop.permute.xlu1 %885 }
 0x612   :  { %v888_v57 = vmul.f32 %v1726_v55, %v886_v56 }
 0x614   :  { %890 = vrot.lane.b32.xlu0 %v888_v57, %s1797_s0 }
 0x686   :  { %v891_v36 = vpop.permute.xlu0 %890 }
 0x687   :  { %v893_v60 = vadd.f32 %v891_v36, %v883_v58 }
 0x689   :  { %1727 = vtanh.f32 %v893_v60 }
 0x68a   :  { %1729 = vpow2.f32 %v1608_v9 }
 0x696   :  { %v1728_v61 = vpop.eup %1727 }
 0x697   :  { %896 = vrot.lane.b32.xlu1 %v1728_v61, %s1797_s0  ;;  %v1730_v62 = vpop.eup %1729 }
 0x698   :  { %v877_v63 = vadd.f32 1.0, %v1730_v62 }
 0x69a   :  { %1731 = vrcp.f32 %v877_v63 }
 0x6a7   :  { %v1732_v0 = vpop.eup %1731 }
 0x709   :  { %v897_v3 = vpop.permute.xlu1 %896 }
 0x70a   :  { %v899_v4 = vmul.f32 %v1732_v0, %v897_v3 }
 0x70c   :  { %901 = vst.msk [vmem:[#allocation3 + $0x10] sm:$0xff] %vm28_vm0, %v899_v4  ;;  %1609 = vmatmul.mubr.msk.f32.vlgmr.msra.gmra.mxu0 %vm28_vm0, %v899_v4 }
 0x70d   :  { %1147 = vmatpush1.msra.mxu0 %v1878_v12  ;;  %1194 = vmatprep.mubr.f32.mxu0 %v1794_v2 }
 0x70e   :  { %1148 = vmatprep.subr.mxu0 %v1887_v14 }
 0x70f   :  { %1149 = vmatpush1.msra.mxu0 %v1892_v15 }
 0x710   :  { %1150 = vmatprep.subr.mxu0 %v1901_v17 }
 0x711   :  { %1151 = vmatpush1.msra.mxu0 %v1906_v18 }
 0x712   :  { %1152 = vmatprep.subr.mxu0 %v1912_v19 }
 0x713   :  { %1153 = vmatpush1.msra.mxu0 %v1918_v20 }
 0x714   :  { %1154 = vmatprep.subr.mxu0 %v1927_v22 }
 0x715   :  { %1155 = vmatpush1.msra.mxu0 %v1936_v24 }
 0x716   :  { %1156 = vmatprep.subr.mxu0 %v1942_v25 }
 0x717   :  { %1157 = vmatpush1.msra.mxu0 %v1948_v26 }
 0x718   :  { %1158 = vmatprep.subr.mxu0 %v1957_v28 }
 0x719   :  { %1159 = vmatpush1.msra.mxu0 %v1966_v30 }
 0x71a   :  { %1160 = vmatprep.subr.mxu0 %v1972_v31 }
 0x71b   :  { %1161 = vmatpush1.msra.mxu0 %v1978_v32 }
 0x71c   :  { %1368 = vmatprep.subr.mxu0 %v1872_v11 }
 0x7cc   :  { %v974_v6 = vpop.f32.mrf.mxu0 }
 0x7cd   :  { %v979_v13 = vadd.f32 %v974_v6, %v2107_v35 }
 0x7ce   :  { %v976_v40 = vpop.f32.mrf.mxu0 }
 0x7cf   :  { %v980_v21 = vadd.f32 %v976_v40, %v2120_v10  ;;  %v1610_v37 = vmul.f32 -1.442695, %v979_v13 }
 0x7d1   :  { %1733 = vtanh.f32 %v980_v21  ;;  %v1611_v10 = vmul.f32 -1.442695, %v980_v21 }
 0x7d2   :  { %1735 = vpow2.f32 %v1610_v37 }
 0x7de   :  { %v1734_v23 = vpop.eup %1733 }
 0x7df   :  { %996 = vrot.lane.b32.xlu0 %v1734_v23, %s1797_s0  ;;  %v1736_v27 = vpop.eup %1735 }
 0x7e0   :  { %v987_v34 = vadd.f32 1.0, %v1736_v27 }
 0x7e2   :  { %1737 = vrcp.f32 %v987_v34 }
 0x7ef   :  { %v1738_v59 = vpop.eup %1737 }
 0x7f0   :  { %v994_v11 = vmul.f32 %v1738_v59, %v893_v60 }
 0x851   :  { %v997_v48 = vpop.permute.xlu0 %996 }
 0x852   :  { %v999_v7 = vmul.f32 %v1738_v59, %v997_v48 }
 0x854   :  { %1001 = vrot.lane.b32.xlu1 %v999_v7, %s1797_s0 }
 0x8c6   :  { %v1002_v5 = vpop.permute.xlu1 %1001 }
 0x8c7   :  { %v1004_v35 = vadd.f32 %v1002_v5, %v994_v11 }
 0x8c9   :  { %1739 = vtanh.f32 %v1004_v35 }
 0x8ca   :  { %1741 = vpow2.f32 %v1611_v10 }
 0x8d6   :  { %v1740_v38 = vpop.eup %1739 }
 0x8d7   :  { %1007 = vrot.lane.b32.xlu0 %v1740_v38, %s1797_s0  ;;  %v1742_v42 = vpop.eup %1741 }
 0x8d8   :  { %v988_v45 = vadd.f32 1.0, %v1742_v42 }
 0x8da   :  { %1743 = vrcp.f32 %v988_v45 }
 0x8e7   :  { %v1744_v46 = vpop.eup %1743 }
 0x949   :  { %v1008_v43 = vpop.permute.xlu0 %1007 }
 0x94a   :  { %v1010_v50 = vmul.f32 %v1744_v46, %v1008_v43 }
 0x94c   :  { %1012 = vst.msk [vmem:[#allocation3 + $0x18] sm:$0xff] %vm28_vm0, %v1010_v50  ;;  %1612 = vmatmul.mubr.msk.f32.vlgmr.msra.gmra.mxu1 %vm28_vm0, %v1010_v50 }
 0x94d   :  { %1258 = vmatpush1.msra.mxu1 %v1878_v12  ;;  %1305 = vmatprep.mubr.f32.mxu1 %v1794_v2 }
 0x94e   :  { %1259 = vmatprep.subr.mxu1 %v1887_v14 }
 0x94f   :  { %1260 = vmatpush1.msra.mxu1 %v1892_v15 }
 0x950   :  { %1261 = vmatprep.subr.mxu1 %v1901_v17 }
 0x951   :  { %1262 = vmatpush1.msra.mxu1 %v1906_v18 }
 0x952   :  { %1263 = vmatprep.subr.mxu1 %v1912_v19 }
 0x953   :  { %1264 = vmatpush1.msra.mxu1 %v1918_v20 }
 0x954   :  { %1265 = vmatprep.subr.mxu1 %v1927_v22 }
 0x955   :  { %1266 = vmatpush1.msra.mxu1 %v1936_v24 }
 0x956   :  { %1267 = vmatprep.subr.mxu1 %v1942_v25 }
 0x957   :  { %1268 = vmatpush1.msra.mxu1 %v1948_v26 }
 0x958   :  { %1269 = vmatprep.subr.mxu1 %v1957_v28 }
 0x959   :  { %1270 = vmatpush1.msra.mxu1 %v1966_v30 }
 0x95a   :  { %1271 = vmatprep.subr.mxu1 %v1972_v31 }
 0x95b   :  { %1272 = vmatpush1.msra.mxu1 %v1978_v32 }
 0x95c   :  { %1642 = vmatprep.subr.mxu1 %v1794_v2 }
 0xa0c   :  { %v1085_v51 = vpop.f32.mrf.mxu1 }
 0xa0d   :  { %v1090_v49 = vadd.f32 %v1085_v51, %v2112_v1 }
 0xa0e   :  { %v1087_v8 = vpop.f32.mrf.mxu1 }
 0xa0f   :  { %v1091_v52 = vadd.f32 %v1087_v8, %v2122_v16  ;;  %v1613_v54 = vmul.f32 -1.442695, %v1090_v49 }
 0xa11   :  { %1745 = vtanh.f32 %v1091_v52  ;;  %v1614_v16 = vmul.f32 -1.442695, %v1091_v52 }
 0xa12   :  { %1747 = vpow2.f32 %v1613_v54 }
 0xa1e   :  { %v1746_v53 = vpop.eup %1745 }
 0xa1f   :  { %1107 = vrot.lane.b32.xlu1 %v1746_v53, %s1797_s0  ;;  %v1748_v55 = vpop.eup %1747 }
 0xa20   :  { %v1098_v56 = vadd.f32 1.0, %v1748_v55 }
 0xa22   :  { %1749 = vrcp.f32 %v1098_v56 }
 0xa2f   :  { %v1750_v57 = vpop.eup %1749 }
 0xa30   :  { %v1105_v60 = vmul.f32 %v1750_v57, %v1004_v35 }
 0xa91   :  { %v1108_v58 = vpop.permute.xlu1 %1107 }
 0xa92   :  { %v1110_v36 = vmul.f32 %v1750_v57, %v1108_v58 }
 0xa94   :  { %1112 = vrot.lane.b32.xlu0 %v1110_v36, %s1797_s0 }
 0xb06   :  { %v1113_v61 = vpop.permute.xlu0 %1112 }
 0xb07   :  { %v1115_v1 = vadd.f32 %v1113_v61, %v1105_v60 }
 0xb09   :  { %1751 = vtanh.f32 %v1115_v1 }
 0xb0a   :  { %1753 = vpow2.f32 %v1614_v16 }
 0xb16   :  { %v1752_v9 = vpop.eup %1751 }
 0xb17   :  { %1118 = vrot.lane.b32.xlu1 %v1752_v9, %s1797_s0  ;;  %v1754_v62 = vpop.eup %1753 }
 0xb18   :  { %v1099_v63 = vadd.f32 1.0, %v1754_v62 }
 0xb1a   :  { %1755 = vrcp.f32 %v1099_v63 }
 0xb27   :  { %v1756_v0 = vpop.eup %1755 }
 0xb89   :  { %v1119_v3 = vpop.permute.xlu1 %1118 }
 0xb8a   :  { %v1121_v4 = vmul.f32 %v1756_v0, %v1119_v3 }
 0xb8c   :  { %1123 = vst.msk [vmem:[#allocation3 + $0x20] sm:$0xff] %vm28_vm0, %v1121_v4  ;;  %1615 = vmatmul.mubr.msk.f32.vlgmr.msra.gmra.mxu0 %vm28_vm0, %v1121_v4 }
 0xb8d   :  { %1369 = vmatpush1.msra.mxu0 %v1878_v12  ;;  %1416 = vmatprep.mubr.f32.mxu0 %v1794_v2 }
 0xb8e   :  { %1370 = vmatprep.subr.mxu0 %v1887_v14 }
 0xb8f   :  { %1371 = vmatpush1.msra.mxu0 %v1892_v15 }
 0xb90   :  { %1372 = vmatprep.subr.mxu0 %v1901_v17 }
 0xb91   :  { %1373 = vmatpush1.msra.mxu0 %v1906_v18 }
 0xb92   :  { %1374 = vmatprep.subr.mxu0 %v1912_v19 }
 0xb93   :  { %1375 = vmatpush1.msra.mxu0 %v1918_v20 }
 0xb94   :  { %1376 = vmatprep.subr.mxu0 %v1927_v22 }
 0xb95   :  { %1377 = vmatpush1.msra.mxu0 %v1936_v24 }
 0xb96   :  { %1378 = vmatprep.subr.mxu0 %v1942_v25 }
 0xb97   :  { %1379 = vmatpush1.msra.mxu0 %v1948_v26 }
 0xb98   :  { %1380 = vmatprep.subr.mxu0 %v1957_v28 }
 0xb99   :  { %1381 = vmatpush1.msra.mxu0 %v1966_v30 }
 0xb9a   :  { %1382 = vmatprep.subr.mxu0 %v1972_v31 }
 0xb9b   :  { %1383 = vmatpush1.msra.mxu0 %v1978_v32 }
 0xc4c   :  { %v1196_v12 = vpop.f32.mrf.mxu0 }
 0xc4d   :  { %v1201_v14 = vadd.f32 %v1196_v12, %v2125_v47 }
 0xc4e   :  { %v1198_v15 = vpop.f32.mrf.mxu0 }
 0xc4f   :  { %v1202_v17 = vadd.f32 %v1198_v15, %v2131_v29  ;;  %v1616_v19 = vmul.f32 -1.442695, %v1201_v14 }
 0xc51   :  { %1757 = vtanh.f32 %v1202_v17  ;;  %v1617_v47 = vmul.f32 -1.442695, %v1202_v17 }
 0xc52   :  { %1759 = vpow2.f32 %v1616_v19  ;;  %v1467_v19 = vld [vmem:[#allocation3 + $0x20] sm:$0xff] }
 0xc5e   :  { %v1758_v18 = vpop.eup %1757 }
 0xc5f   :  { %1218 = vrot.lane.b32.xlu0 %v1758_v18, %s1797_s0  ;;  %v1760_v20 = vpop.eup %1759 }
 0xc60   :  { %v1209_v22 = vadd.f32 1.0, %v1760_v20  ;;  %v1466_v20 = vld [vmem:[#allocation3 + $0x18] sm:$0xff] }
 0xc62   :  { %1761 = vrcp.f32 %v1209_v22  ;;  %v1465_v22 = vld [vmem:[#allocation3 + $0x10] sm:$0xff] }
 0xc6f   :  { %v1762_v24 = vpop.eup %1761 }
 0xc70   :  { %v1216_v28 = vmul.f32 %v1762_v24, %v1115_v1 }
 0xcd1   :  { %v1219_v25 = vpop.permute.xlu0 %1218 }
 0xcd2   :  { %v1221_v26 = vmul.f32 %v1762_v24, %v1219_v25  ;;  %v1464_v24 = vld [vmem:[#allocation3 + $0x8] sm:$0xff]  ;;  %v1463_v25 = vld [vmem:[#allocation3] sm:$0xff] }
 0xcd4   :  { %1223 = vrot.lane.b32.xlu1 %v1221_v26, %s1797_s0  ;;  %v1471_v26 = vld [vmem:[%s2318_s4] sm:$0xff] }
 0xd46   :  { %v1224_v30 = vpop.permute.xlu1 %1223 }
 0xd47   :  { %v1226_v31 = vadd.f32 %v1224_v30, %v1216_v28 }
 0xd49   :  { %1763 = vtanh.f32 %v1226_v31 }
 0xd4a   :  { %1765 = vpow2.f32 %v1617_v47 }
 0xd56   :  { %v1764_v32 = vpop.eup %1763 }
 0xd57   :  { %1229 = vrot.lane.b32.xlu0 %v1764_v32, %s1797_s0  ;;  %v1766_v29 = vpop.eup %1765 }
 0xd58   :  { %v1210_v6 = vadd.f32 1.0, %v1766_v29 }
 0xd5a   :  { %1767 = vrcp.f32 %v1210_v6 }
 0xd67   :  { %v1768_v13 = vpop.eup %1767 }
 0xdc9   :  { %v1230_v40 = vpop.permute.xlu0 %1229 }
 0xdca   :  { %v1232_v21 = vmul.f32 %v1768_v13, %v1230_v40 }
 0xdcc   :  { %1234 = vst.msk [vmem:[#allocation3 + $0x28] sm:$0xff] %vm28_vm0, %v1232_v21  ;;  %1618 = vmatmul.mubr.msk.f32.vlgmr.msra.gmra.mxu1 %vm28_vm0, %v1232_v21 }
 0xdcd   :  { %1658 = vmatprep.mubr.msk.f32.mxu1 %vm1798_vm1, %v1794_v2 }
 0xdd3   :  { %v1468_v18 = vld [vmem:[#allocation3 + $0x28] sm:$0xff] }
 0xe8c   :  { %v1307_v23 = vpop.f32.mrf.mxu1 }
 0xe8d   :  { %v1312_v37 = vadd.f32 %v1307_v23, %v2134_v33 }
 0xe8e   :  { %v1309_v27 = vpop.f32.mrf.mxu1 }
 0xe8f   :  { %v1313_v34 = vadd.f32 %v1309_v27, %v2141_v41  ;;  %v1619_v48 = vmul.f32 -1.442695, %v1312_v37 }
 0xe91   :  { %1769 = vtanh.f32 %v1313_v34  ;;  %v1620_v41 = vmul.f32 -1.442695, %v1313_v34 }
 0xe92   :  { %1771 = vpow2.f32 %v1619_v48 }
 0xe9e   :  { %v1770_v59 = vpop.eup %1769 }
 0xe9f   :  { %1329 = vrot.lane.b32.xlu1 %v1770_v59, %s1797_s0  ;;  %v1772_v7 = vpop.eup %1771 }
 0xea0   :  { %v1320_v11 = vadd.f32 1.0, %v1772_v7 }
 0xea2   :  { %1773 = vrcp.f32 %v1320_v11 }
 0xeaf   :  { %v1774_v5 = vpop.eup %1773 }
 0xeb0   :  { %v1327_v10 = vmul.f32 %v1774_v5, %v1226_v31 }
 0xf11   :  { %v1330_v35 = vpop.permute.xlu1 %1329 }
 0xf12   :  { %v1332_v38 = vmul.f32 %v1774_v5, %v1330_v35 }
 0xf14   :  { %1334 = vrot.lane.b32.xlu0 %v1332_v38, %s1797_s0 }
 0xf86   :  { %v1335_v42 = vpop.permute.xlu0 %1334 }
 0xf87   :  { %v1337_v33 = vadd.f32 %v1335_v42, %v1327_v10 }
 0xf89   :  { %1775 = vtanh.f32 %v1337_v33 }
 0xf8a   :  { %1777 = vpow2.f32 %v1620_v41 }
 0xf96   :  { %v1776_v45 = vpop.eup %1775 }
 0xf97   :  { %1340 = vrot.lane.b32.xlu1 %v1776_v45, %s1797_s0  ;;  %v1778_v46 = vpop.eup %1777 }
 0xf98   :  { %v1321_v43 = vadd.f32 1.0, %v1778_v46 }
 0xf9a   :  { %1779 = vrcp.f32 %v1321_v43 }
 0xfa7   :  { %v1780_v50 = vpop.eup %1779 }
0x1009   :  { %v1341_v51 = vpop.permute.xlu1 %1340 }
0x100a   :  { %v1343_v49 = vmul.f32 %v1780_v50, %v1341_v51 }
0x100c   :  { %1345 = vst.msk [vmem:[#allocation3 + $0x30] sm:$0xff] %vm28_vm0, %v1343_v49  ;;  %1621 = vmatmul.mubr.msk.f32.vlgmr.msra.gmra.mxu0 %vm28_vm0, %v1343_v49 }
0x1013   :  { %v1469_v17 = vld [vmem:[#allocation3 + $0x30] sm:$0xff] }
0x10cc   :  { %v1418_v8 = vpop.f32.mrf.mxu0 }
0x10cd   :  { %v1423_v52 = vadd.f32 %v1418_v8, %v2138_v39 }
0x10ce   :  { %v1420_v53 = vpop.f32.mrf.mxu0 }
0x10cf   :  { %v1424_v54 = vadd.f32 %v1420_v53, %v2143_v44  ;;  %v1622_v56 = vmul.f32 -1.442695, %v1423_v52  ;;  %v1472_v44 = vld [vmem:[%s2317_s5] sm:$0xff] }
0x10d1   :  { %1781 = vtanh.f32 %v1424_v54  ;;  %v1623_v62 = vmul.f32 -1.442695, %v1424_v54 }
0x10d2   :  { %1783 = vpow2.f32 %v1622_v56 }
0x10de   :  { %v1782_v55 = vpop.eup %1781 }
0x10df   :  { %1440 = vrot.lane.b32.xlu0 %v1782_v55, %s1797_s0  ;;  %v1784_v57 = vpop.eup %1783 }
0x10e0   :  { %v1431_v58 = vadd.f32 1.0, %v1784_v57 }
0x10e2   :  { %1785 = vrcp.f32 %v1431_v58 }
0x10ef   :  { %v1786_v36 = vpop.eup %1785 }
0x10f0   :  { %v1438_v1 = vmul.f32 %v1786_v36, %v1337_v33 }
0x1151   :  { %v1441_v60 = vpop.permute.xlu0 %1440 }
0x1152   :  { %v1443_v61 = vmul.f32 %v1786_v36, %v1441_v60 }
0x1154   :  { %1445 = vrot.lane.b32.xlu1 %v1443_v61, %s1797_s0 }
0x1158   :  { %1475 = vperm.xlu1 %1667, %v1472_v44  }
0x11c6   :  { %v1446_v9 = vpop.permute.xlu1 %1445 }
0x11c7   :  { %v1448_v39 = vadd.f32 %v1446_v9, %v1438_v1 }
0x11c9   :  { %1787 = vtanh.f32 %v1448_v39 }
0x11ca   :  { %1789 = vpow2.f32 %v1623_v62 }
0x11d3   :  { %v1476_v28 = vpop.permute.xlu1 %1475 }
0x11d6   :  { %v1788_v16 = vpop.eup %1787 }
0x11d7   :  { %1451 = vrot.lane.b32.xlu0 %v1788_v16, %s1797_s0  ;;  %v1790_v63 = vpop.eup %1789 }
0x11d8   :  { %v1432_v0 = vadd.f32 1.0, %v1790_v63 }
0x11da   :  { %1791 = vrcp.f32 %v1432_v0 }
0x11db   :  { %1459 = vrot.lane.b32.xlu0 %v1448_v39, %s1797_s0 }
0x11e7   :  { %v1792_v3 = vpop.eup %1791 }
0x1249   :  { %v1452_v4 = vpop.permute.xlu0 %1451 }
0x124a   :  { %v1454_v12 = vmul.f32 %v1792_v3, %v1452_v4 }
0x124c   :  { %1456 = vst.msk [vmem:[#allocation3 + $0x38] sm:$0xff] %vm28_vm0, %v1454_v12  ;;  %1457 = vst.msk [vmem:[#allocation4] sm:$0xff] %vm28_vm0, %v1454_v12 }
0x124d   :  { %v1460_v14 = vpop.permute.xlu0 %1459 }
0x124e   :  { %1462 = vst.msk [vmem:[#allocation5] sm:$0xff] %vm28_vm0, %v1460_v14 }
0x1253   :  { %v1470_v15 = vld [vmem:[#allocation3 + $0x38] sm:$0xff] }
0x1254   :  { %1643 = vmatpush3.xpose.msk.msra.mxu1 %vm28_vm0, %v1470_v15 }
0x1255   :  { %1644 = vmatprep.subr.mxu1 %v1794_v2 }
0x1258   :  { %1645 = vmatpush3.xpose.msk.msra.mxu1 %vm28_vm0, %v1469_v17 }
0x1259   :  { %1646 = vmatprep.subr.mxu1 %v1794_v2 }
0x125c   :  { %1647 = vmatpush3.xpose.msk.msra.mxu1 %vm28_vm0, %v1468_v18 }
0x125d   :  { %1648 = vmatprep.subr.mxu1 %v1794_v2 }
0x1260   :  { %1649 = vmatpush3.xpose.msk.msra.mxu1 %vm28_vm0, %v1467_v19 }
0x1261   :  { %1650 = vmatprep.subr.mxu1 %v1794_v2 }
0x1264   :  { %1651 = vmatpush3.xpose.msk.msra.mxu1 %vm28_vm0, %v1466_v20 }
0x1265   :  { %1652 = vmatprep.subr.mxu1 %v1794_v2 }
0x1268   :  { %1653 = vmatpush3.xpose.msk.msra.mxu1 %vm28_vm0, %v1465_v22 }
0x1269   :  { %1654 = vmatprep.subr.mxu1 %v1794_v2 }
0x126c   :  { %1655 = vmatpush3.xpose.msk.msra.mxu1 %vm28_vm0, %v1464_v24 }
0x126d   :  { %1656 = vmatprep.subr.mxu1 %v1794_v2 }
0x1270   :  { %1657 = vmatpush3.xpose.msk.msra.mxu1 %vm28_vm0, %v1463_v25 }
0x1273   :  { %1659 = vmatmul.mubr.msk.f32.vlgmr.msra.gmra.mxu1 %vm28_vm0, %v1471_v26 }
0x1333   :  { %v1571_v30 = vpop.f32.mrf.mxu1 }
0x1334   :  { %v1572_v31 = vadd.f32 %v1571_v30, %v1476_v28 }
0x1335   :  { %v1660_v32 = vpop.f32.mrf.mxu1 }
0x1336   :  { %1575 = vst.msk [vmem:[%s2319_s6] sm:$0xff] %vm28_vm0, %v1572_v31 }

</bundles_post_ra>
